<compile_context>
chip_gen: v7x
topology: tpu7x:2x2x1
jax: 0.10.0
libtpu: 0.0.40
codegen_flags: <defaults>
</compile_context>

<pallas_src>
import math
import functools

import numpy as np
import jax
import jax.numpy as jnp
from jax import lax
from jax.experimental import pallas as pl
from jax.experimental.pallas import tpu as pltpu


# -------------------------- Pallas kernels --------------------------

def gene_mlp_kernel(x_ref, ge_ref, tcb1_ref, tcb2_ref,
                    w1x_ref, w1g_ref, b1_ref, w2_ref, b2_ref,
                    w3h_ref, w3x_ref, b3_ref, w4_ref, b4_ref, wf_ref,
                    p_ref):
    """Per-gene MLP with genes on lanes, features (D<=16) on sublanes.

    Weight refs are (D_out, D_in) so the matmuls are W @ h with a large
    gene-tile N dimension.  P[c, g] = final_w . h2[c, g, :].
    """
    n_cell = x_ref.shape[0]
    x = x_ref[...]                      # (n_cell, TG) raw expression ("original")
    tx = jnp.tanh(x)                    # tanh from the gene_emb Sequential
    tge = ge_ref[...]                   # (D, TG) tanh(gene_emb), precomputed in glue

    w1x = w1x_ref[...]; b1 = b1_ref[...]
    w2 = w2_ref[...];   b2 = b2_ref[...]
    w3h = w3h_ref[...]; w3x = w3x_ref[...]; b3 = b3_ref[...]
    w4 = w4_ref[...];   b4 = b4_ref[...]
    wf = wf_ref[...]

    # Shared across all cells: l1 applied to the gene-embedding columns.
    g1 = jnp.dot(w1g_ref[...], tge, preferred_element_type=jnp.float32)   # (D, TG)

    for c in range(n_cell):             # n_cell is small & static -> unrolled
        xr = x[c:c + 1, :]              # (1, TG) raw x
        txr = tx[c:c + 1, :]            # (1, TG) tanh(x)

        # --- Block 1: l1 acts on concat([tanh(x), tanh(gene_emb)]) ---
        h = jnp.tanh(w1x * txr + g1 + b1)                     # (D, TG)
        h = h + tcb1_ref[:, c:c + 1]    # tanh(time_mlp) + tanh(celltype_mlp)
        h = jnp.tanh(jnp.dot(w2, h, preferred_element_type=jnp.float32) + b2)

        # --- Block 2: input is concat([h, raw x]) ---
        h = jnp.tanh(jnp.dot(w3h, h, preferred_element_type=jnp.float32)
                     + w3x * xr + b3)
        h = h + tcb2_ref[:, c:c + 1]
        h = jnp.tanh(jnp.dot(w4, h, preferred_element_type=jnp.float32) + b4)

        # Final linear weight via VPU multiply + sublane reduce (bias is added
        # after the adjacency contraction -- algebraically identical).
        p_ref[c:c + 1, :] = jnp.sum(wf * h, axis=0, keepdims=True)   # (1, TG)


def adj_matmul_kernel(p_ref, a_ref, bf_ref, o_ref, acc_ref, *, tau):
    """z = P @ (I - soft_threshold(A, tau) * (1 - eye)) + final_bias.

    P is fully VMEM-resident (constant block index); the (n_cell, tk)
    contraction tile is sliced out of it per reduction step.
    """
    j = pl.program_id(0)                 # output gene tile   (parallel)
    k = pl.program_id(1)                 # source gene tile   (reduction, innermost)
    tk, tn = a_ref.shape

    @pl.when(k == 0)
    def _():
        acc_ref[...] = jnp.zeros_like(acc_ref)

    a = a_ref[...]                                      # (tk, tn) raw adj_A tile
    sgn = jnp.where(a > 0, 1.0, jnp.where(a < 0, -1.0, 0.0))
    clean = sgn * jnp.maximum(jnp.abs(a) - tau, 0.0)    # soft thresholding

    rows = k * tk + lax.broadcasted_iota(jnp.int32, (tk, tn), 0)
    cols = j * tn + lax.broadcasted_iota(jnp.int32, (tk, tn), 1)
    # I - clean_A * (1 - eye):  diag -> 1, off-diag -> -clean_A
    i_minus_a = jnp.where(rows == cols, 1.0, -clean)

    p_tile = p_ref[:, pl.ds(pl.multiple_of(k * tk, 128), tk)]   # (n_cell, tk)
    acc_ref[...] += jnp.dot(p_tile, i_minus_a,
                            preferred_element_type=jnp.float32)

    @pl.when(k == pl.num_programs(1) - 1)
    def _():
        o_ref[...] = acc_ref[...] + bf_ref[0, 0]        # scalar bias from SMEM


# -------------------------- pallas_call wrappers --------------------------

def gene_mlp_call(x, tge, tcb1_t, tcb2_t, wparams, *, gene_tile):
    n_cell, n_gene = x.shape
    d = tge.shape[0]
    assert n_gene % gene_tile == 0 and gene_tile % 128 == 0, (
        "n_gene must be padded to a multiple of the 128-lane gene tile")
    grid = (n_gene // gene_tile,)

    def gene_spec(rows):
        return pl.BlockSpec((rows, gene_tile), lambda g: (0, g))

    def full_spec(a):
        return pl.BlockSpec(a.shape, lambda g: (0, 0))

    in_specs = ([gene_spec(n_cell), gene_spec(d), full_spec(tcb1_t),
                 full_spec(tcb2_t)] + [full_spec(w) for w in wparams])

    return pl.pallas_call(
        gene_mlp_kernel,
        out_shape=jax.ShapeDtypeStruct((n_cell, n_gene), jnp.float32),
        grid_spec=pltpu.PrefetchScalarGridSpec(
            num_scalar_prefetch=0, grid=grid,
            in_specs=in_specs, out_specs=gene_spec(n_cell)),
        compiler_params=pltpu.CompilerParams(
            dimension_semantics=("parallel",)),
    )(x, tge, tcb1_t, tcb2_t, *wparams)


def adj_matmul_call(P, adj_A, final_b, *, tau, tn, tk):
    n_cell, n_gene = P.shape
    assert n_gene % tn == 0 and n_gene % tk == 0, (
        "n_gene must be padded to a multiple of the adjacency tiles")
    assert tn % 128 == 0 and tk % 128 == 0
    grid = (n_gene // tn, n_gene // tk)
    kernel = functools.partial(adj_matmul_kernel, tau=tau)

    return pl.pallas_call(
        kernel,
        out_shape=jax.ShapeDtypeStruct((n_cell, n_gene), jnp.float32),
        grid_spec=pltpu.PrefetchScalarGridSpec(
            num_scalar_prefetch=0, grid=grid,
            in_specs=[
                # P fully resident in VMEM: constant block index => single DMA,
                # reused for every output tile.
                pl.BlockSpec((n_cell, n_gene), lambda j, k: (0, 0)),
                pl.BlockSpec((tk, tn), lambda j, k: (k, j)),
                # Scalar final bias in SMEM (a (1,1) VMEM block would pad to a
                # full (8,128) tile and cost a vector load per tile).
                pl.BlockSpec(memory_space=pltpu.MemorySpace.SMEM),
            ],
            out_specs=pl.BlockSpec((n_cell, tn), lambda j, k: (0, j)),
            scratch_shapes=[pltpu.VMEM((n_cell, tn), jnp.float32)]),
        compiler_params=pltpu.CompilerParams(
            dimension_semantics=("parallel", "arbitrary")),
    )(P, adj_A, final_b)


# -------------------------- forward (glue + kernels) --------------------------

def regdiffusion_forward(params, x, t, ct, time_dim, *,
                         gene_tile=None, adj_tn=None, adj_tk=None):
    n_cell, n_gene = x.shape

    # glue: sinusoidal time embedding + time MLP + celltype embedding (tiny, per-cell)
    half = time_dim // 2
    scale = math.log(10000.0) / (half - 1)
    freqs = jnp.exp(jnp.arange(half, dtype=jnp.float32) * -scale)
    emb = t[:, None] * freqs[None, :]
    sin_emb = jnp.concatenate([jnp.sin(emb), jnp.cos(emb)], axis=-1)
    h_time = jnp.tanh(sin_emb @ params["time_w"].T + params["time_b"])
    h_ct = params["ct_emb"][ct]

    tcb = []
    for blk in params["blocks"]:
        t_emb = jnp.tanh(h_time @ blk["tw"].T + blk["tb"])
        c_emb = jnp.tanh(h_ct @ blk["cw"].T + blk["cb"])
        tcb.append((t_emb + c_emb).T.astype(jnp.float32))     # (D, n_cell)

    # gene-emb tanh hoisted out of the kernel (computed once, not per cell);
    # transposed so genes sit on the lane axis.
    tge = jnp.tanh(params["gene_emb"]).T.astype(jnp.float32)  # (D, n_gene)

    b1, b2 = params["blocks"]
    wparams = (
        b1["l1_w"][:, :1],          # w1x (D, 1)  column multiplying tanh(x)
        b1["l1_w"][:, 1:],          # W1g (D, D)  columns for tanh(gene_emb)
        b1["l1_b"][:, None],        # b1  (D, 1)
        b1["l2_w"],                 # W2  (D, D)
        b1["l2_b"][:, None],        # b2
        b2["l1_w"][:, :-1],         # W3h (D, D)  columns for h
        b2["l1_w"][:, -1:],         # w3x (D, 1)  column for raw x ("original")
        b2["l1_b"][:, None],        # b3
        b2["l2_w"],                 # W4
        b2["l2_b"][:, None],        # b4
        params["final_w"].T,        # wf  (D, 1)
    )
    wparams = tuple(jnp.asarray(w, jnp.float32) for w in wparams)

    if gene_tile is None:
        gene_tile = min(n_gene, 2048)              # large tiles amortize per-step overhead
        if n_gene // gene_tile < 2 and n_gene % 256 == 0:
            gene_tile = n_gene // 2                # keep >=2 parallel tiles (megacore)

    P = gene_mlp_call(x.astype(jnp.float32), tge, tcb[0], tcb[1], wparams,
                      gene_tile=gene_tile)

    # Adjacency tiles: 256 fills the v6e/v7x 256-wide MXU; clamp for small
    # n_gene and keep >=2 output tiles so the parallel j axis can shard.
    if adj_tk is None:
        adj_tk = min(256, n_gene)
    if adj_tn is None:
        adj_tn = min(256, n_gene)
        if n_gene // adj_tn < 2 and n_gene % 256 == 0:
            adj_tn = n_gene // 2

    tau = (1.0 / (n_gene - 1)) / 2.0
    z = adj_matmul_call(P, params["adj_A"].astype(jnp.float32),
                        params["final_b"].reshape(1, 1).astype(jnp.float32),
                        tau=tau, tn=adj_tn, tk=adj_tk)
    return z                                             # (n_cell, n_gene)


# -------------------------- pure-JAX reference --------------------------

def reference_forward(params, x, t, ct, time_dim):
    n_cell, n_gene = x.shape
    half = time_dim // 2
    scale = math.log(10000.0) / (half - 1)
    freqs = jnp.exp(jnp.arange(half, dtype=jnp.float32) * -scale)
    emb = t[:, None] * freqs[None, :]
    sin_emb = jnp.concatenate([jnp.sin(emb), jnp.cos(emb)], axis=-1)
    h_time = jnp.tanh(sin_emb @ params["time_w"].T + params["time_b"])
    h_ct = params["ct_emb"][ct]
    original = x[:, :, None]
    ge = jnp.broadcast_to(params["gene_emb"][None],
                          (n_cell,) + params["gene_emb"].shape)
    h_x = jnp.tanh(jnp.concatenate([original, ge], axis=-1))
    for i, blk in enumerate(params["blocks"]):
        if i != 0:
            h_x = jnp.concatenate([h_x, original], axis=-1)
        h = jnp.tanh(jnp.einsum("ogd,kd->ogk", h_x, blk["l1_w"]) + blk["l1_b"])
        t_emb = jnp.tanh(h_time @ blk["tw"].T + blk["tb"])[:, None, :]
        c_emb = jnp.tanh(h_ct @ blk["cw"].T + blk["cb"])[:, None, :]
        h = h + t_emb + c_emb
        h_x = jnp.tanh(jnp.einsum("ogd,kd->ogk", h, blk["l2_w"]) + blk["l2_b"])
    tau = (1.0 / (n_gene - 1)) / 2.0
    a = params["adj_A"]
    clean = jnp.sign(a) * jnp.maximum(jnp.abs(a) - tau, 0.0)
    eye = jnp.eye(n_gene, dtype=jnp.float32)
    i_minus_a = eye - clean * (1.0 - eye)
    hz = jnp.einsum("ogd,gh->ohd", h_x, i_minus_a)
    z = jnp.einsum("ohd,kd->ohk", hz, params["final_w"]) + params["final_b"]
    return z[..., 0]


# -------------------------- deterministic parameter init --------------------------

def init_params(key, n_gene, gene_dim, time_dim, n_celltype, celltype_dim, hidden_dims):
    ks = list(jax.random.split(key, 32))
    it = iter(ks)

    def nrm(shape, scale=0.2):
        return scale * jax.random.normal(next(it), shape, dtype=jnp.float32)

    gene_reg_norm = 1.0 / (n_gene - 1)
    params = {
        "gene_emb": nrm((n_gene, gene_dim - 1), 1.0),
        "adj_A": (jnp.full((n_gene, n_gene), gene_reg_norm * 5.0, jnp.float32)
                  + nrm((n_gene, n_gene), 0.01)),
        "time_w": nrm((time_dim, time_dim)),
        "time_b": nrm((time_dim,)),
        "ct_emb": nrm((n_celltype, celltype_dim), 1.0),
        "final_w": nrm((1, hidden_dims[-1] - 1)),
        "final_b": nrm((1,)),
        "blocks": [],
    }
    for i in range(len(hidden_dims) - 1):
        in_dim, out_dim = hidden_dims[i], hidden_dims[i + 1] - 1
        params["blocks"].append({
            "tw": nrm((out_dim, time_dim)), "tb": nrm((out_dim,)),
            "cw": nrm((out_dim, celltype_dim)), "cb": nrm((out_dim,)),
            "l1_w": nrm((out_dim, in_dim)), "l1_b": nrm((out_dim,)),
            "l2_w": nrm((out_dim, out_dim)), "l2_b": nrm((out_dim,)),
        })
    return params


# -------------------------- main --------------------------

if __name__ == "__main__":
    N_GENE, N_CELL = 256, 4
    TIME_DIM, N_CELLTYPE, CELLTYPE_DIM = 8, 3, 4
    HIDDEN = [16, 16, 16]

    key = jax.random.PRNGKey(0)
    kp, kx, kt, kc = jax.random.split(key, 4)
    params = init_params(kp, N_GENE, HIDDEN[0], TIME_DIM,
                         N_CELLTYPE, CELLTYPE_DIM, HIDDEN)
    x = jax.random.normal(kx, (N_CELL, N_GENE), dtype=jnp.float32)
    t = jax.random.uniform(kt, (N_CELL,), dtype=jnp.float32,
                           minval=0.0, maxval=1000.0)
    ct = jax.random.randint(kc, (N_CELL,), 0, N_CELLTYPE)

    fwd = jax.jit(functools.partial(regdiffusion_forward, time_dim=TIME_DIM))
    z = jax.block_until_ready(fwd(params, x, t, ct))
    assert z.shape == (N_CELL, N_GENE) and z.dtype == jnp.float32

    z_ref = jax.block_until_ready(reference_forward(params, x, t, ct, TIME_DIM))
    np.testing.assert_allclose(np.asarray(z), np.asarray(z_ref),
                               rtol=2e-3, atol=2e-4)
    print("KERNEL_OK")
</pallas_src>

<mosaic_0001>
module attributes {stable_mosaic.version = 11 : i64} {
  func.func @adj_matmul_kernel(%arg0: i32, %arg1: i32, %arg2: memref<4x256xf32, #tpu.memory_space<vmem>>, %arg3: memref<256x128xf32, #tpu.memory_space<vmem>>, %arg4: memref<1x1xf32, #tpu.memory_space<smem>>, %arg5: memref<4x128xf32, #tpu.memory_space<vmem>>, %arg6: memref<4x128xf32, #tpu.memory_space<vmem>>) attributes {dimension_semantics = [#tpu.dimension_semantics<parallel>, #tpu.dimension_semantics<arbitrary>], iteration_bounds = array<i64: 2, 1>, scalar_prefetch = 0 : i64, scratch_operands = 1 : i64, tpu.core_type = #tpu.core_type<tc>, window_params = [{pipeline_mode = #tpu.pipeline_mode<synchronous>, transform_indices = @transform_0, window_bounds = array<i64: 4, 256>}, {transform_indices = @transform_1, window_bounds = array<i64: 256, 128>}, {transform_indices = @transform_2, window_bounds = array<i64: 1, 1>}, {transform_indices = @transform_3, window_bounds = array<i64: 4, 128>}]} {
    %c0_i32 = arith.constant 0 : i32
    %0 = arith.cmpi eq, %arg1, %c0_i32 : i32
    %1 = arith.extui %0 : i1 to i32
    %c0_i32_0 = arith.constant 0 : i32
    %2 = arith.cmpi ne, %1, %c0_i32_0 : i32
    scf.if %2 {
      %cst_19 = arith.constant 0.000000e+00 : f32
      %43 = vector.broadcast %cst_19 : f32 to vector<4x128xf32>
      %c0_20 = arith.constant 0 : index
      %c0_21 = arith.constant 0 : index
      %44 = vector.load %arg6[%c0_20, %c0_21] : memref<4x128xf32, #tpu.memory_space<vmem>>, vector<4x128xf32>
      tpu.vector_store %arg6[%c0_20, %c0_21], %43 {strides = array<i32>} : memref<4x128xf32, #tpu.memory_space<vmem>>, vector<4x128xf32>,
    } else {
    }
    %c0 = arith.constant 0 : index
    %c0_1 = arith.constant 0 : index
    %3 = vector.load %arg3[%c0, %c0_1] : memref<256x128xf32, #tpu.memory_space<vmem>>, vector<256x128xf32>
    %cst = arith.constant 0.000000e+00 : f32
    %4 = vector.broadcast %cst : f32 to vector<256x128xf32>
    %5 = arith.cmpf ogt, %3, %4 : vector<256x128xf32>
    %cst_2 = arith.constant 0.000000e+00 : f32
    %6 = vector.broadcast %cst_2 : f32 to vector<256x128xf32>
    %7 = arith.cmpf olt, %3, %6 : vector<256x128xf32>
    %cst_3 = arith.constant -1.000000e+00 : f32
    %cst_4 = arith.constant 0.000000e+00 : f32
    %8 = vector.broadcast %cst_3 : f32 to vector<256x128xf32>
    %9 = vector.broadcast %cst_4 : f32 to vector<256x128xf32>
    %10 = arith.select %7, %8, %9 : vector<256x128xi1>, vector<256x128xf32>
    %cst_5 = arith.constant 1.000000e+00 : f32
    %11 = vector.broadcast %cst_5 : f32 to vector<256x128xf32>
    %12 = arith.select %5, %11, %10 : vector<256x128xi1>, vector<256x128xf32>
    %13 = math.absf %3 : vector<256x128xf32>
    %cst_6 = arith.constant 0.00196078443 : f32
    %14 = vector.broadcast %cst_6 : f32 to vector<256x128xf32>
    %15 = arith.subf %13, %14 : vector<256x128xf32>
    %cst_7 = arith.constant 0.000000e+00 : f32
    %16 = vector.broadcast %cst_7 : f32 to vector<256x128xf32>
    %17 = arith.maximumf %15, %16 : vector<256x128xf32>
    %18 = arith.mulf %12, %17 : vector<256x128xf32>
    %c256_i32 = arith.constant 256 : i32
    %19 = arith.muli %arg1, %c256_i32 : i32
    %20 = tpu.iota {dimensions = array<i32: 0>} : vector<256x128xi32>
    %21 = vector.broadcast %19 : i32 to vector<256x128xi32>
    %22 = arith.addi %21, %20 : vector<256x128xi32>
    %c128_i32 = arith.constant 128 : i32
    %23 = arith.muli %arg0, %c128_i32 : i32
    %24 = tpu.iota {dimensions = array<i32: 1>} : vector<256x128xi32>
    %25 = vector.broadcast %23 : i32 to vector<256x128xi32>
    %26 = arith.addi %25, %24 : vector<256x128xi32>
    %27 = arith.cmpi eq, %22, %26 : vector<256x128xi32>
    %cst_8 = arith.constant 0.000000e+00 : f32
    %28 = vector.broadcast %cst_8 : f32 to vector<256x128xf32>
    %29 = arith.subf %28, %18 : vector<256x128xf32>
    %cst_9 = arith.constant 1.000000e+00 : f32
    %30 = vector.broadcast %cst_9 : f32 to vector<256x128xf32>
    %31 = arith.select %27, %30, %29 : vector<256x128xi1>, vector<256x128xf32>
    %c256_i32_10 = arith.constant 256 : i32
    %32 = arith.muli %arg1, %c256_i32_10 : i32
    %33 = tpu.assume_multiple %32, 128 : i32
    %c0_11 = arith.constant 0 : index
    %34 = arith.index_cast %33 : i32 to index
    %35 = vector.load %arg2[%c0_11, %34] : memref<4x256xf32, #tpu.memory_space<vmem>>, vector<4x256xf32>
    %c0_12 = arith.constant 0 : index
    %c0_13 = arith.constant 0 : index
    %36 = vector.load %arg6[%c0_12, %c0_13] : memref<4x128xf32, #tpu.memory_space<vmem>>, vector<4x128xf32>
    %cst_14 = arith.constant dense<0.000000e+00> : vector<4x128xf32>
    %37 = tpu.matmul %35, %31, %cst_14 {dimension_numbers = #tpu.dot_dimension_numbers<[1], [0], [0], [1], [0, 0, 1, 1], [], []>} : vector<4x256xf32>, vector<256x128xf32>, vector<4x128xf32> -> vector<4x128xf32>
    %38 = arith.addf %36, %37 : vector<4x128xf32>
    %c0_15 = arith.constant 0 : index
    %c0_16 = arith.constant 0 : index
    %39 = vector.load %arg6[%c0_15, %c0_16] : memref<4x128xf32, #tpu.memory_space<vmem>>, vector<4x128xf32>
    tpu.vector_store %arg6[%c0_15, %c0_16], %38 {strides = array<i32>} : memref<4x128xf32, #tpu.memory_space<vmem>>, vector<4x128xf32>,
    %c0_i32_17 = arith.constant 0 : i32
    %40 = arith.cmpi eq, %arg1, %c0_i32_17 : i32
    %41 = arith.extui %40 : i1 to i32
    %c0_i32_18 = arith.constant 0 : i32
    %42 = arith.cmpi ne, %41, %c0_i32_18 : i32
    scf.if %42 {
      %c0_19 = arith.constant 0 : index
      %c0_20 = arith.constant 0 : index
      %43 = vector.load %arg6[%c0_19, %c0_20] : memref<4x128xf32, #tpu.memory_space<vmem>>, vector<4x128xf32>
      %c0_21 = arith.constant 0 : index
      %c0_22 = arith.constant 0 : index
      %44 = memref.load %arg4[%c0_21, %c0_22] : memref<1x1xf32, #tpu.memory_space<smem>>
      %45 = vector.broadcast %44 : f32 to vector<4x128xf32>
      %46 = arith.addf %43, %45 : vector<4x128xf32>
      %c0_23 = arith.constant 0 : index
      %c0_24 = arith.constant 0 : index
      %47 = vector.load %arg5[%c0_23, %c0_24] : memref<4x128xf32, #tpu.memory_space<vmem>>, vector<4x128xf32>
      tpu.vector_store %arg5[%c0_23, %c0_24], %46 {strides = array<i32>} : memref<4x128xf32, #tpu.memory_space<vmem>>, vector<4x128xf32>,
    } else {
    }
    return
  }
  func.func @transform_0(%arg0: i32, %arg1: i32) -> (i32, i32) {
    %c0_i32 = arith.constant 0 : i32
    %c0_i32_0 = arith.constant 0 : i32
    %c0_i32_1 = arith.constant 0 : i32
    return %c0_i32, %c0_i32_0 : i32, i32
  }
  func.func @transform_1(%arg0: i32, %arg1: i32) -> (i32, i32) {
    %c0_i32 = arith.constant 0 : i32
    return %arg1, %arg0 : i32, i32
  }
  func.func @transform_2(%arg0: i32, %arg1: i32) -> (i32, i32) {
    %c0_i32 = arith.constant 0 : i32
    %c0_i32_0 = arith.constant 0 : i32
    %c0_i32_1 = arith.constant 0 : i32
    return %c0_i32, %c0_i32_0 : i32, i32
  }
  func.func @transform_3(%arg0: i32, %arg1: i32) -> (i32, i32) {
    %c0_i32 = arith.constant 0 : i32
    %c0_i32_0 = arith.constant 0 : i32
    return %c0_i32, %arg0 : i32, i32
  }
}

module attributes {stable_mosaic.version = 11 : i64} {
  func.func @gene_mlp_kernel(%arg0: i32, %arg1: memref<4x128xf32, #tpu.memory_space<vmem>>, %arg2: memref<15x128xf32, #tpu.memory_space<vmem>>, %arg3: memref<15x4xf32, #tpu.memory_space<vmem>>, %arg4: memref<15x4xf32, #tpu.memory_space<vmem>>, %arg5: memref<15x1xf32, #tpu.memory_space<vmem>>, %arg6: memref<15x15xf32, #tpu.memory_space<vmem>>, %arg7: memref<15x1xf32, #tpu.memory_space<vmem>>, %arg8: memref<15x15xf32, #tpu.memory_space<vmem>>, %arg9: memref<15x1xf32, #tpu.memory_space<vmem>>, %arg10: memref<15x15xf32, #tpu.memory_space<vmem>>, %arg11: memref<15x1xf32, #tpu.memory_space<vmem>>, %arg12: memref<15x1xf32, #tpu.memory_space<vmem>>, %arg13: memref<15x15xf32, #tpu.memory_space<vmem>>, %arg14: memref<15x1xf32, #tpu.memory_space<vmem>>, %arg15: memref<15x1xf32, #tpu.memory_space<vmem>>, %arg16: memref<4x128xf32, #tpu.memory_space<vmem>>) attributes {dimension_semantics = [#tpu.dimension_semantics<parallel>], iteration_bounds = array<i64: 2>, scalar_prefetch = 0 : i64, scratch_operands = 0 : i64, tpu.core_type = #tpu.core_type<tc>, window_params = [{transform_indices = @transform_0, window_bounds = array<i64: 4, 128>}, {transform_indices = @transform_1, window_bounds = array<i64: 15, 128>}, {pipeline_mode = #tpu.pipeline_mode<synchronous>, transform_indices = @transform_2, window_bounds = array<i64: 15, 4>}, {pipeline_mode = #tpu.pipeline_mode<synchronous>, transform_indices = @transform_3, window_bounds = array<i64: 15, 4>}, {pipeline_mode = #tpu.pipeline_mode<synchronous>, transform_indices = @transform_4, window_bounds = array<i64: 15, 1>}, {pipeline_mode = #tpu.pipeline_mode<synchronous>, transform_indices = @transform_5, window_bounds = array<i64: 15, 15>}, {pipeline_mode = #tpu.pipeline_mode<synchronous>, transform_indices = @transform_6, window_bounds = array<i64: 15, 1>}, {pipeline_mode = #tpu.pipeline_mode<synchronous>, transform_indices = @transform_7, window_bounds = array<i64: 15, 15>}, {pipeline_mode = #tpu.pipeline_mode<synchronous>, transform_indices = @transform_8, window_bounds = array<i64: 15, 1>}, {pipeline_mode = #tpu.pipeline_mode<synchronous>, transform_indices = @transform_9, window_bounds = array<i64: 15, 15>}, {pipeline_mode = #tpu.pipeline_mode<synchronous>, transform_indices = @transform_10, window_bounds = array<i64: 15, 1>}, {pipeline_mode = #tpu.pipeline_mode<synchronous>, transform_indices = @transform_11, window_bounds = array<i64: 15, 1>}, {pipeline_mode = #tpu.pipeline_mode<synchronous>, transform_indices = @transform_12, window_bounds = array<i64: 15, 15>}, {pipeline_mode = #tpu.pipeline_mode<synchronous>, transform_indices = @transform_13, window_bounds = array<i64: 15, 1>}, {pipeline_mode = #tpu.pipeline_mode<synchronous>, transform_indices = @transform_14, window_bounds = array<i64: 15, 1>}, {transform_indices = @transform_15, window_bounds = array<i64: 4, 128>}]} {
    %c0 = arith.constant 0 : index
    %c0_0 = arith.constant 0 : index
    %0 = vector.load %arg1[%c0, %c0_0] : memref<4x128xf32, #tpu.memory_space<vmem>>, vector<4x128xf32>
    %1 = math.tanh %0 : vector<4x128xf32>
    %c0_1 = arith.constant 0 : index
    %c0_2 = arith.constant 0 : index
    %2 = vector.load %arg2[%c0_1, %c0_2] : memref<15x128xf32, #tpu.memory_space<vmem>>, vector<15x128xf32>
    %c0_3 = arith.constant 0 : index
    %c0_4 = arith.constant 0 : index
    %3 = vector.load %arg5[%c0_3, %c0_4] : memref<15x1xf32, #tpu.memory_space<vmem>>, vector<15x1xf32>
    %c0_5 = arith.constant 0 : index
    %c0_6 = arith.constant 0 : index
    %4 = vector.load %arg7[%c0_5, %c0_6] : memref<15x1xf32, #tpu.memory_space<vmem>>, vector<15x1xf32>
    %c0_7 = arith.constant 0 : index
    %c0_8 = arith.constant 0 : index
    %5 = vector.load %arg8[%c0_7, %c0_8] : memref<15x15xf32, #tpu.memory_space<vmem>>, vector<15x15xf32>
    %c0_9 = arith.constant 0 : index
    %c0_10 = arith.constant 0 : index
    %6 = vector.load %arg9[%c0_9, %c0_10] : memref<15x1xf32, #tpu.memory_space<vmem>>, vector<15x1xf32>
    %c0_11 = arith.constant 0 : index
    %c0_12 = arith.constant 0 : index
    %7 = vector.load %arg10[%c0_11, %c0_12] : memref<15x15xf32, #tpu.memory_space<vmem>>, vector<15x15xf32>
    %c0_13 = arith.constant 0 : index
    %c0_14 = arith.constant 0 : index
    %8 = vector.load %arg11[%c0_13, %c0_14] : memref<15x1xf32, #tpu.memory_space<vmem>>, vector<15x1xf32>
    %c0_15 = arith.constant 0 : index
    %c0_16 = arith.constant 0 : index
    %9 = vector.load %arg12[%c0_15, %c0_16] : memref<15x1xf32, #tpu.memory_space<vmem>>, vector<15x1xf32>
    %c0_17 = arith.constant 0 : index
    %c0_18 = arith.constant 0 : index
    %10 = vector.load %arg13[%c0_17, %c0_18] : memref<15x15xf32, #tpu.memory_space<vmem>>, vector<15x15xf32>
    %c0_19 = arith.constant 0 : index
    %c0_20 = arith.constant 0 : index
    %11 = vector.load %arg14[%c0_19, %c0_20] : memref<15x1xf32, #tpu.memory_space<vmem>>, vector<15x1xf32>
    %c0_21 = arith.constant 0 : index
    %c0_22 = arith.constant 0 : index
    %12 = vector.load %arg15[%c0_21, %c0_22] : memref<15x1xf32, #tpu.memory_space<vmem>>, vector<15x1xf32>
    %c0_23 = arith.constant 0 : index
    %c0_24 = arith.constant 0 : index
    %13 = vector.load %arg6[%c0_23, %c0_24] : memref<15x15xf32, #tpu.memory_space<vmem>>, vector<15x15xf32>
    %cst = arith.constant dense<0.000000e+00> : vector<15x128xf32>
    %14 = tpu.matmul %13, %2, %cst {dimension_numbers = #tpu.dot_dimension_numbers<[1], [0], [0], [1], [0, 0, 1, 1], [], []>} : vector<15x15xf32>, vector<15x128xf32>, vector<15x128xf32> -> vector<15x128xf32>
    %15 = vector.extract_strided_slice %0 {offsets = [0, 0], sizes = [1, 128], strides = [1, 1]} : vector<4x128xf32> to vector<1x128xf32>
    %16 = vector.extract_strided_slice %1 {offsets = [0, 0], sizes = [1, 128], strides = [1, 1]} : vector<4x128xf32> to vector<1x128xf32>
    %17 = vector.broadcast %3 : vector<15x1xf32> to vector<15x128xf32>
    %18 = vector.broadcast %16 : vector<1x128xf32> to vector<15x128xf32>
    %19 = arith.mulf %17, %18 : vector<15x128xf32>
    %20 = arith.addf %19, %14 : vector<15x128xf32>
    %21 = vector.broadcast %4 : vector<15x1xf32> to vector<15x128xf32>
    %22 = arith.addf %20, %21 : vector<15x128xf32>
    %23 = math.tanh %22 : vector<15x128xf32>
    %c0_25 = arith.constant 0 : index
    %c0_26 = arith.constant 0 : index
    %24 = vector.load %arg3[%c0_25, %c0_26] : memref<15x4xf32, #tpu.memory_space<vmem>>, vector<15x1xf32>
    %25 = vector.broadcast %24 : vector<15x1xf32> to vector<15x128xf32>
    %26 = arith.addf %23, %25 : vector<15x128xf32>
    %cst_27 = arith.constant dense<0.000000e+00> : vector<15x128xf32>
    %27 = tpu.matmul %5, %26, %cst_27 {dimension_numbers = #tpu.dot_dimension_numbers<[1], [0], [0], [1], [0, 0, 1, 1], [], []>} : vector<15x15xf32>, vector<15x128xf32>, vector<15x128xf32> -> vector<15x128xf32>
    %28 = vector.broadcast %6 : vector<15x1xf32> to vector<15x128xf32>
    %29 = arith.addf %27, %28 : vector<15x128xf32>
    %30 = math.tanh %29 : vector<15x128xf32>
    %cst_28 = arith.constant dense<0.000000e+00> : vector<15x128xf32>
    %31 = tpu.matmul %7, %30, %cst_28 {dimension_numbers = #tpu.dot_dimension_numbers<[1], [0], [0], [1], [0, 0, 1, 1], [], []>} : vector<15x15xf32>, vector<15x128xf32>, vector<15x128xf32> -> vector<15x128xf32>
    %32 = vector.broadcast %8 : vector<15x1xf32> to vector<15x128xf32>
    %33 = vector.broadcast %15 : vector<1x128xf32> to vector<15x128xf32>
    %34 = arith.mulf %32, %33 : vector<15x128xf32>
    %35 = arith.addf %31, %34 : vector<15x128xf32>
    %36 = vector.broadcast %9 : vector<15x1xf32> to vector<15x128xf32>
    %37 = arith.addf %35, %36 : vector<15x128xf32>
    %38 = math.tanh %37 : vector<15x128xf32>
    %c0_29 = arith.constant 0 : index
    %c0_30 = arith.constant 0 : index
    %39 = vector.load %arg4[%c0_29, %c0_30] : memref<15x4xf32, #tpu.memory_space<vmem>>, vector<15x1xf32>
    %40 = vector.broadcast %39 : vector<15x1xf32> to vector<15x128xf32>
    %41 = arith.addf %38, %40 : vector<15x128xf32>
    %cst_31 = arith.constant dense<0.000000e+00> : vector<15x128xf32>
    %42 = tpu.matmul %10, %41, %cst_31 {dimension_numbers = #tpu.dot_dimension_numbers<[1], [0], [0], [1], [0, 0, 1, 1], [], []>} : vector<15x15xf32>, vector<15x128xf32>, vector<15x128xf32> -> vector<15x128xf32>
    %43 = vector.broadcast %11 : vector<15x1xf32> to vector<15x128xf32>
    %44 = arith.addf %42, %43 : vector<15x128xf32>
    %45 = math.tanh %44 : vector<15x128xf32>
    %46 = vector.broadcast %12 : vector<15x1xf32> to vector<15x128xf32>
    %47 = arith.mulf %46, %45 : vector<15x128xf32>
    %cst_32 = arith.constant dense<0.000000e+00> : vector<128xf32>
    %48 = vector.multi_reduction <add>, %47, %cst_32 [0] : vector<15x128xf32> to vector<128xf32>
    %49 = vector.shape_cast %48 : vector<128xf32> to vector<1x128xf32>
    %c0_33 = arith.constant 0 : index
    %c0_34 = arith.constant 0 : index
    %50 = vector.load %arg16[%c0_33, %c0_34] : memref<4x128xf32, #tpu.memory_space<vmem>>, vector<1x128xf32>
    tpu.vector_store %arg16[%c0_33, %c0_34], %49 {strides = array<i32>} : memref<4x128xf32, #tpu.memory_space<vmem>>, vector<1x128xf32>,
    %51 = vector.extract_strided_slice %0 {offsets = [1, 0], sizes = [1, 128], strides = [1, 1]} : vector<4x128xf32> to vector<1x128xf32>
    %52 = vector.extract_strided_slice %1 {offsets = [1, 0], sizes = [1, 128], strides = [1, 1]} : vector<4x128xf32> to vector<1x128xf32>
    %53 = vector.broadcast %3 : vector<15x1xf32> to vector<15x128xf32>
    %54 = vector.broadcast %52 : vector<1x128xf32> to vector<15x128xf32>
    %55 = arith.mulf %53, %54 : vector<15x128xf32>
    %56 = arith.addf %55, %14 : vector<15x128xf32>
    %57 = vector.broadcast %4 : vector<15x1xf32> to vector<15x128xf32>
    %58 = arith.addf %56, %57 : vector<15x128xf32>
    %59 = math.tanh %58 : vector<15x128xf32>
    %c0_35 = arith.constant 0 : index
    %c1 = arith.constant 1 : index
    %60 = vector.load %arg3[%c0_35, %c1] : memref<15x4xf32, #tpu.memory_space<vmem>>, vector<15x1xf32>
    %61 = vector.broadcast %60 : vector<15x1xf32> to vector<15x128xf32>
    %62 = arith.addf %59, %61 : vector<15x128xf32>
    %cst_36 = arith.constant dense<0.000000e+00> : vector<15x128xf32>
    %63 = tpu.matmul %5, %62, %cst_36 {dimension_numbers = #tpu.dot_dimension_numbers<[1], [0], [0], [1], [0, 0, 1, 1], [], []>} : vector<15x15xf32>, vector<15x128xf32>, vector<15x128xf32> -> vector<15x128xf32>
    %64 = vector.broadcast %6 : vector<15x1xf32> to vector<15x128xf32>
    %65 = arith.addf %63, %64 : vector<15x128xf32>
    %66 = math.tanh %65 : vector<15x128xf32>
    %cst_37 = arith.constant dense<0.000000e+00> : vector<15x128xf32>
    %67 = tpu.matmul %7, %66, %cst_37 {dimension_numbers = #tpu.dot_dimension_numbers<[1], [0], [0], [1], [0, 0, 1, 1], [], []>} : vector<15x15xf32>, vector<15x128xf32>, vector<15x128xf32> -> vector<15x128xf32>
    %68 = vector.broadcast %8 : vector<15x1xf32> to vector<15x128xf32>
    %69 = vector.broadcast %51 : vector<1x128xf32> to vector<15x128xf32>
    %70 = arith.mulf %68, %69 : vector<15x128xf32>
    %71 = arith.addf %67, %70 : vector<15x128xf32>
    %72 = vector.broadcast %9 : vector<15x1xf32> to vector<15x128xf32>
    %73 = arith.addf %71, %72 : vector<15x128xf32>
    %74 = math.tanh %73 : vector<15x128xf32>
    %c0_38 = arith.constant 0 : index
    %c1_39 = arith.constant 1 : index
    %75 = vector.load %arg4[%c0_38, %c1_39] : memref<15x4xf32, #tpu.memory_space<vmem>>, vector<15x1xf32>
    %76 = vector.broadcast %75 : vector<15x1xf32> to vector<15x128xf32>
    %77 = arith.addf %74, %76 : vector<15x128xf32>
    %cst_40 = arith.constant dense<0.000000e+00> : vector<15x128xf32>
    %78 = tpu.matmul %10, %77, %cst_40 {dimension_numbers = #tpu.dot_dimension_numbers<[1], [0], [0], [1], [0, 0, 1, 1], [], []>} : vector<15x15xf32>, vector<15x128xf32>, vector<15x128xf32> -> vector<15x128xf32>
    %79 = vector.broadcast %11 : vector<15x1xf32> to vector<15x128xf32>
    %80 = arith.addf %78, %79 : vector<15x128xf32>
    %81 = math.tanh %80 : vector<15x128xf32>
    %82 = vector.broadcast %12 : vector<15x1xf32> to vector<15x128xf32>
    %83 = arith.mulf %82, %81 : vector<15x128xf32>
    %cst_41 = arith.constant dense<0.000000e+00> : vector<128xf32>
    %84 = vector.multi_reduction <add>, %83, %cst_41 [0] : vector<15x128xf32> to vector<128xf32>
    %85 = vector.shape_cast %84 : vector<128xf32> to vector<1x128xf32>
    %c1_42 = arith.constant 1 : index
    %c0_43 = arith.constant 0 : index
    %86 = vector.load %arg16[%c1_42, %c0_43] : memref<4x128xf32, #tpu.memory_space<vmem>>, vector<1x128xf32>
    tpu.vector_store %arg16[%c1_42, %c0_43], %85 {strides = array<i32>} : memref<4x128xf32, #tpu.memory_space<vmem>>, vector<1x128xf32>,
    %87 = vector.extract_strided_slice %0 {offsets = [2, 0], sizes = [1, 128], strides = [1, 1]} : vector<4x128xf32> to vector<1x128xf32>
    %88 = vector.extract_strided_slice %1 {offsets = [2, 0], sizes = [1, 128], strides = [1, 1]} : vector<4x128xf32> to vector<1x128xf32>
    %89 = vector.broadcast %3 : vector<15x1xf32> to vector<15x128xf32>
    %90 = vector.broadcast %88 : vector<1x128xf32> to vector<15x128xf32>
    %91 = arith.mulf %89, %90 : vector<15x128xf32>
    %92 = arith.addf %91, %14 : vector<15x128xf32>
    %93 = vector.broadcast %4 : vector<15x1xf32> to vector<15x128xf32>
    %94 = arith.addf %92, %93 : vector<15x128xf32>
    %95 = math.tanh %94 : vector<15x128xf32>
    %c0_44 = arith.constant 0 : index
    %c2 = arith.constant 2 : index
    %96 = vector.load %arg3[%c0_44, %c2] : memref<15x4xf32, #tpu.memory_space<vmem>>, vector<15x1xf32>
    %97 = vector.broadcast %96 : vector<15x1xf32> to vector<15x128xf32>
    %98 = arith.addf %95, %97 : vector<15x128xf32>
    %cst_45 = arith.constant dense<0.000000e+00> : vector<15x128xf32>
    %99 = tpu.matmul %5, %98, %cst_45 {dimension_numbers = #tpu.dot_dimension_numbers<[1], [0], [0], [1], [0, 0, 1, 1], [], []>} : vector<15x15xf32>, vector<15x128xf32>, vector<15x128xf32> -> vector<15x128xf32>
    %100 = vector.broadcast %6 : vector<15x1xf32> to vector<15x128xf32>
    %101 = arith.addf %99, %100 : vector<15x128xf32>
    %102 = math.tanh %101 : vector<15x128xf32>
    %cst_46 = arith.constant dense<0.000000e+00> : vector<15x128xf32>
    %103 = tpu.matmul %7, %102, %cst_46 {dimension_numbers = #tpu.dot_dimension_numbers<[1], [0], [0], [1], [0, 0, 1, 1], [], []>} : vector<15x15xf32>, vector<15x128xf32>, vector<15x128xf32> -> vector<15x128xf32>
    %104 = vector.broadcast %8 : vector<15x1xf32> to vector<15x128xf32>
    %105 = vector.broadcast %87 : vector<1x128xf32> to vector<15x128xf32>
    %106 = arith.mulf %104, %105 : vector<15x128xf32>
    %107 = arith.addf %103, %106 : vector<15x128xf32>
    %108 = vector.broadcast %9 : vector<15x1xf32> to vector<15x128xf32>
    %109 = arith.addf %107, %108 : vector<15x128xf32>
    %110 = math.tanh %109 : vector<15x128xf32>
    %c0_47 = arith.constant 0 : index
    %c2_48 = arith.constant 2 : index
    %111 = vector.load %arg4[%c0_47, %c2_48] : memref<15x4xf32, #tpu.memory_space<vmem>>, vector<15x1xf32>
    %112 = vector.broadcast %111 : vector<15x1xf32> to vector<15x128xf32>
    %113 = arith.addf %110, %112 : vector<15x128xf32>
    %cst_49 = arith.constant dense<0.000000e+00> : vector<15x128xf32>
    %114 = tpu.matmul %10, %113, %cst_49 {dimension_numbers = #tpu.dot_dimension_numbers<[1], [0], [0], [1], [0, 0, 1, 1], [], []>} : vector<15x15xf32>, vector<15x128xf32>, vector<15x128xf32> -> vector<15x128xf32>
    %115 = vector.broadcast %11 : vector<15x1xf32> to vector<15x128xf32>
    %116 = arith.addf %114, %115 : vector<15x128xf32>
    %117 = math.tanh %116 : vector<15x128xf32>
    %118 = vector.broadcast %12 : vector<15x1xf32> to vector<15x128xf32>
    %119 = arith.mulf %118, %117 : vector<15x128xf32>
    %cst_50 = arith.constant dense<0.000000e+00> : vector<128xf32>
    %120 = vector.multi_reduction <add>, %119, %cst_50 [0] : vector<15x128xf32> to vector<128xf32>
    %121 = vector.shape_cast %120 : vector<128xf32> to vector<1x128xf32>
    %c2_51 = arith.constant 2 : index
    %c0_52 = arith.constant 0 : index
    %122 = vector.load %arg16[%c2_51, %c0_52] : memref<4x128xf32, #tpu.memory_space<vmem>>, vector<1x128xf32>
    tpu.vector_store %arg16[%c2_51, %c0_52], %121 {strides = array<i32>} : memref<4x128xf32, #tpu.memory_space<vmem>>, vector<1x128xf32>,
    %123 = vector.extract_strided_slice %0 {offsets = [3, 0], sizes = [1, 128], strides = [1, 1]} : vector<4x128xf32> to vector<1x128xf32>
    %124 = vector.extract_strided_slice %1 {offsets = [3, 0], sizes = [1, 128], strides = [1, 1]} : vector<4x128xf32> to vector<1x128xf32>
    %125 = vector.broadcast %3 : vector<15x1xf32> to vector<15x128xf32>
    %126 = vector.broadcast %124 : vector<1x128xf32> to vector<15x128xf32>
    %127 = arith.mulf %125, %126 : vector<15x128xf32>
    %128 = arith.addf %127, %14 : vector<15x128xf32>
    %129 = vector.broadcast %4 : vector<15x1xf32> to vector<15x128xf32>
    %130 = arith.addf %128, %129 : vector<15x128xf32>
    %131 = math.tanh %130 : vector<15x128xf32>
    %c0_53 = arith.constant 0 : index
    %c3 = arith.constant 3 : index
    %132 = vector.load %arg3[%c0_53, %c3] : memref<15x4xf32, #tpu.memory_space<vmem>>, vector<15x1xf32>
    %133 = vector.broadcast %132 : vector<15x1xf32> to vector<15x128xf32>
    %134 = arith.addf %131, %133 : vector<15x128xf32>
    %cst_54 = arith.constant dense<0.000000e+00> : vector<15x128xf32>
    %135 = tpu.matmul %5, %134, %cst_54 {dimension_numbers = #tpu.dot_dimension_numbers<[1], [0], [0], [1], [0, 0, 1, 1], [], []>} : vector<15x15xf32>, vector<15x128xf32>, vector<15x128xf32> -> vector<15x128xf32>
    %136 = vector.broadcast %6 : vector<15x1xf32> to vector<15x128xf32>
    %137 = arith.addf %135, %136 : vector<15x128xf32>
    %138 = math.tanh %137 : vector<15x128xf32>
    %cst_55 = arith.constant dense<0.000000e+00> : vector<15x128xf32>
    %139 = tpu.matmul %7, %138, %cst_55 {dimension_numbers = #tpu.dot_dimension_numbers<[1], [0], [0], [1], [0, 0, 1, 1], [], []>} : vector<15x15xf32>, vector<15x128xf32>, vector<15x128xf32> -> vector<15x128xf32>
    %140 = vector.broadcast %8 : vector<15x1xf32> to vector<15x128xf32>
    %141 = vector.broadcast %123 : vector<1x128xf32> to vector<15x128xf32>
    %142 = arith.mulf %140, %141 : vector<15x128xf32>
    %143 = arith.addf %139, %142 : vector<15x128xf32>
    %144 = vector.broadcast %9 : vector<15x1xf32> to vector<15x128xf32>
    %145 = arith.addf %143, %144 : vector<15x128xf32>
    %146 = math.tanh %145 : vector<15x128xf32>
    %c0_56 = arith.constant 0 : index
    %c3_57 = arith.constant 3 : index
    %147 = vector.load %arg4[%c0_56, %c3_57] : memref<15x4xf32, #tpu.memory_space<vmem>>, vector<15x1xf32>
    %148 = vector.broadcast %147 : vector<15x1xf32> to vector<15x128xf32>
    %149 = arith.addf %146, %148 : vector<15x128xf32>
    %cst_58 = arith.constant dense<0.000000e+00> : vector<15x128xf32>
    %150 = tpu.matmul %10, %149, %cst_58 {dimension_numbers = #tpu.dot_dimension_numbers<[1], [0], [0], [1], [0, 0, 1, 1], [], []>} : vector<15x15xf32>, vector<15x128xf32>, vector<15x128xf32> -> vector<15x128xf32>
    %151 = vector.broadcast %11 : vector<15x1xf32> to vector<15x128xf32>
    %152 = arith.addf %150, %151 : vector<15x128xf32>
    %153 = math.tanh %152 : vector<15x128xf32>
    %154 = vector.broadcast %12 : vector<15x1xf32> to vector<15x128xf32>
    %155 = arith.mulf %154, %153 : vector<15x128xf32>
    %cst_59 = arith.constant dense<0.000000e+00> : vector<128xf32>
    %156 = vector.multi_reduction <add>, %155, %cst_59 [0] : vector<15x128xf32> to vector<128xf32>
    %157 = vector.shape_cast %156 : vector<128xf32> to vector<1x128xf32>
    %c3_60 = arith.constant 3 : index
    %c0_61 = arith.constant 0 : index
    %158 = vector.load %arg16[%c3_60, %c0_61] : memref<4x128xf32, #tpu.memory_space<vmem>>, vector<1x128xf32>
    tpu.vector_store %arg16[%c3_60, %c0_61], %157 {strides = array<i32>} : memref<4x128xf32, #tpu.memory_space<vmem>>, vector<1x128xf32>,
    return
  }
  func.func @transform_0(%arg0: i32) -> (i32, i32) {
    %c0_i32 = arith.constant 0 : i32
    %c0_i32_0 = arith.constant 0 : i32
    return %c0_i32, %arg0 : i32, i32
  }
  func.func @transform_1(%arg0: i32) -> (i32, i32) {
    %c0_i32 = arith.constant 0 : i32
    %c0_i32_0 = arith.constant 0 : i32
    return %c0_i32, %arg0 : i32, i32
  }
  func.func @transform_2(%arg0: i32) -> (i32, i32) {
    %c0_i32 = arith.constant 0 : i32
    %c0_i32_0 = arith.constant 0 : i32
    %c0_i32_1 = arith.constant 0 : i32
    return %c0_i32, %c0_i32_0 : i32, i32
  }
  func.func @transform_3(%arg0: i32) -> (i32, i32) {
    %c0_i32 = arith.constant 0 : i32
    %c0_i32_0 = arith.constant 0 : i32
    %c0_i32_1 = arith.constant 0 : i32
    return %c0_i32, %c0_i32_0 : i32, i32
  }
  func.func @transform_4(%arg0: i32) -> (i32, i32) {
    %c0_i32 = arith.constant 0 : i32
    %c0_i32_0 = arith.constant 0 : i32
    %c0_i32_1 = arith.constant 0 : i32
    return %c0_i32, %c0_i32_0 : i32, i32
  }
  func.func @transform_5(%arg0: i32) -> (i32, i32) {
    %c0_i32 = arith.constant 0 : i32
    %c0_i32_0 = arith.constant 0 : i32
    %c0_i32_1 = arith.constant 0 : i32
    return %c0_i32, %c0_i32_0 : i32, i32
  }
  func.func @transform_6(%arg0: i32) -> (i32, i32) {
    %c0_i32 = arith.constant 0 : i32
    %c0_i32_0 = arith.constant 0 : i32
    %c0_i32_1 = arith.constant 0 : i32
    return %c0_i32, %c0_i32_0 : i32, i32
  }
  func.func @transform_7(%arg0: i32) -> (i32, i32) {
    %c0_i32 = arith.constant 0 : i32
    %c0_i32_0 = arith.constant 0 : i32
    %c0_i32_1 = arith.constant 0 : i32
    return %c0_i32, %c0_i32_0 : i32, i32
  }
  func.func @transform_8(%arg0: i32) -> (i32, i32) {
    %c0_i32 = arith.constant 0 : i32
    %c0_i32_0 = arith.constant 0 : i32
    %c0_i32_1 = arith.constant 0 : i32
    return %c0_i32, %c0_i32_0 : i32, i32
  }
  func.func @transform_9(%arg0: i32) -> (i32, i32) {
    %c0_i32 = arith.constant 0 : i32
    %c0_i32_0 = arith.constant 0 : i32
    %c0_i32_1 = arith.constant 0 : i32
    return %c0_i32, %c0_i32_0 : i32, i32
  }
  func.func @transform_10(%arg0: i32) -> (i32, i32) {
    %c0_i32 = arith.constant 0 : i32
    %c0_i32_0 = arith.constant 0 : i32
    %c0_i32_1 = arith.constant 0 : i32
    return %c0_i32, %c0_i32_0 : i32, i32
  }
  func.func @transform_11(%arg0: i32) -> (i32, i32) {
    %c0_i32 = arith.constant 0 : i32
    %c0_i32_0 = arith.constant 0 : i32
    %c0_i32_1 = arith.constant 0 : i32
    return %c0_i32, %c0_i32_0 : i32, i32
  }
  func.func @transform_12(%arg0: i32) -> (i32, i32) {
    %c0_i32 = arith.constant 0 : i32
    %c0_i32_0 = arith.constant 0 : i32
    %c0_i32_1 = arith.constant 0 : i32
    return %c0_i32, %c0_i32_0 : i32, i32
  }
  func.func @transform_13(%arg0: i32) -> (i32, i32) {
    %c0_i32 = arith.constant 0 : i32
    %c0_i32_0 = arith.constant 0 : i32
    %c0_i32_1 = arith.constant 0 : i32
    return %c0_i32, %c0_i32_0 : i32, i32
  }
  func.func @transform_14(%arg0: i32) -> (i32, i32) {
    %c0_i32 = arith.constant 0 : i32
    %c0_i32_0 = arith.constant 0 : i32
    %c0_i32_1 = arith.constant 0 : i32
    return %c0_i32, %c0_i32_0 : i32, i32
  }
  func.func @transform_15(%arg0: i32) -> (i32, i32) {
    %c0_i32 = arith.constant 0 : i32
    %c0_i32_0 = arith.constant 0 : i32
    return %c0_i32, %arg0 : i32, i32
  }
}

</mosaic_0001>

<bundles_post_ra>
// kernel: regdiffusion_forward.3
= control target key start
LH: loop header
LB: loop body
LE: loop exit
PB: predicated region body
PF: predicated region fallthrough
CT: control target
= control target key end

     0   :  { %s1669_s0 = inlined_call_operand.vmem [shape: f32[4,256], index: 0, kind: input, shape index: {}]   ;;  %s1670_s1 = inlined_call_operand.vmem [shape: f32[256,256], index: 1, kind: input, shape index: {}]   ;;  %s1671_s2 = inlined_call_operand.<no memory space> [shape: f32[1,1], index: 2, kind: input, shape index: {}]   ;;  %s1672_s3 = inlined_call_operand.hbm [shape: f32[4,256], index: 3, kind: output, shape index: {}]  }
   0x1   :  { %8 = sst [smem:[#allocation3]] %s1671_s2 }
   0x2   :  { %9 = vsyncpa [#allocation6], 0 }
   0x3   :  { %11 = vsyncpa [#allocation6 + $0x1], 0  ;;  %s1262_s14 = smov 0   ;;  %s1264_s15 = smov 0  }
   0x4   :  { %s1266_s16 = smov 0   ;;  %s1268_s17 = smov 0  }
   0x5   :  { %s1270_s18 = smov 0   ;;  %s1272_s19 = smov 0  }
   0x6 LB: > { %s987_s2 = sadd.s32 4294967295, %s1235_s19   ;;  %s988_s20 = sadd.s32 4294967294, %s1235_s19   ;;  %s1235_s19 = sphi %s1272_s19, %s17_s19   ;;  %s1231_s18 = sphi %s1270_s18, %s1679_s18   ;;  %s1227_s17 = sphi %s1268_s17, %s1678_s17   ;;  %s1223_s16 = sphi %s1266_s16, %s1677_s16   ;;  %s1219_s15 = sphi %s1264_s15, %s1676_s15   ;;  %s1215_s14 = sphi %s1262_s14, %s1675_s14  }
   0x7   : > { %s29_s21 = sadd.s32 1, %s1231_s18  ;;  %s59_s22 = sadd.s32 1, %s1223_s16 }
   0x8   : > { %p31_p0 = scmp.ge.s32.totalorder %s29_s21, 2  ;;  %p66_p1 = scmp.ne.s32.totalorder %s1223_s16, %s1219_s15 }
   0x9   : > { %p67_p2 = scmp.eq.s32.totalorder %s1235_s19, 0  ;;  %p117_p3 = scmp.eq.s32.totalorder %s987_s2, 1 }
   0xa   : > { %s1681_s21 = smov (%p31_p0, %s29_s21), 0  ;;  %p122_p6 = scmp.ne.s32.totalorder %s1219_s15, %s1215_s14 }
   0xb   : > { %p68_p4 = por %p67_p2, %p66_p1  ;;  %p1301_p5 = por %p117_p3, %p66_p1 }
   0xc   : > { %s55_s24 = ssub.s32 %s1231_s18, %s1681_s21  ;;  %p123_p8 = scmp.eq.s32.totalorder %s988_s20, 1 }
   0xd   : > { %p57_p7 = scmp.eq.s32.totalorder %s55_s24, 0  ;;  %p990_p10 = scmp.ge.s32.totalorder %s1235_s19, 2 }
   0xe   : > { %p1312_p9 = por %p123_p8, %p122_p6 }
   0xf   : > { %s1310_s25 = scalar_select %p57_p7, %s1223_s16, %s59_s22  }
  0x10   : > { %145 = sbr.rel (%p990_p10) target bundleno = 43 (0x2b), region = 24 }
  0x17   : > { %148 = sbr.rel (!%p68_p4) target bundleno = 43 (0x2b), region = 28  ;;  %s150_s27 = sand.u32 (%p68_p4), 1, %s1223_s16  }
  0x18   : > { %s992_s28 = sshll.u32 (%p68_p4), %s1231_s18, 3  ;;  %s991_s29 = sshll.u32 (%p68_p4), %s150_s27, 8 }
  0x19   : > { %s1324_s5 = scalar_lea.vmem (%p68_p4), %s1670_s1, %s992_s28  ;;  %s1329_s6 = scalar_lea.vmem (%p68_p4), [#allocation4], %s991_s29 }
  0x1a   : > { %v247_v0 = vld [vmem:[%s1324_s5] sm:$0xff] (%p68_p4)  ;;  %v249_v1 = vld [vmem:[%s1324_s5 + $0x10] sm:$0xff] (%p68_p4) }
  0x1b   : > { %v251_v2 = vld [vmem:[%s1324_s5 + $0x20] sm:$0xff] (%p68_p4)  ;;  %248 = vst [vmem:[%s1329_s6] sm:$0xff] (%p68_p4), %v247_v0  ;;  %250 = vst [vmem:[%s1329_s6 + $0x8] sm:$0xff] (%p68_p4), %v249_v1  ;;  %v253_v3 = vld [vmem:[%s1324_s5 + $0x30] sm:$0xff] (%p68_p4) }
  0x1c   : > { %252 = vst [vmem:[%s1329_s6 + $0x10] sm:$0xff] (%p68_p4), %v251_v2  ;;  %v255_v4 = vld [vmem:[%s1324_s5 + $0x40] sm:$0xff] (%p68_p4)  ;;  %v257_v5 = vld [vmem:[%s1324_s5 + $0x50] sm:$0xff] (%p68_p4)  ;;  %254 = vst [vmem:[%s1329_s6 + $0x18] sm:$0xff] (%p68_p4), %v253_v3 }
  0x1d   : > { %256 = vst [vmem:[%s1329_s6 + $0x20] sm:$0xff] (%p68_p4), %v255_v4  ;;  %258 = vst [vmem:[%s1329_s6 + $0x28] sm:$0xff] (%p68_p4), %v257_v5  ;;  %v259_v6 = vld [vmem:[%s1324_s5 + $0x60] sm:$0xff] (%p68_p4)  ;;  %v261_v7 = vld [vmem:[%s1324_s5 + $0x70] sm:$0xff] (%p68_p4) }
  0x1e   : > { %v263_v8 = vld [vmem:[%s1324_s5 + $0x80] sm:$0xff]  ;;  %260 = vst [vmem:[%s1329_s6 + $0x30] sm:$0xff] %v259_v6  ;;  %262 = vst [vmem:[%s1329_s6 + $0x38] sm:$0xff] %v261_v7  ;;  %v265_v9 = vld [vmem:[%s1324_s5 + $0x90] sm:$0xff] }
  0x1f   : > { %264 = vst [vmem:[%s1329_s6 + $0x40] sm:$0xff] %v263_v8  ;;  %v267_v10 = vld [vmem:[%s1324_s5 + $0xa0] sm:$0xff]  ;;  %v269_v11 = vld [vmem:[%s1324_s5 + $0xb0] sm:$0xff]  ;;  %266 = vst [vmem:[%s1329_s6 + $0x48] sm:$0xff] %v265_v9 }
  0x20   : > { %268 = vst [vmem:[%s1329_s6 + $0x50] sm:$0xff] %v267_v10  ;;  %270 = vst [vmem:[%s1329_s6 + $0x58] sm:$0xff] %v269_v11  ;;  %v271_v12 = vld [vmem:[%s1324_s5 + $0xc0] sm:$0xff]  ;;  %v273_v13 = vld [vmem:[%s1324_s5 + $0xd0] sm:$0xff] }
  0x21   : > { %v275_v14 = vld [vmem:[%s1324_s5 + $0xe0] sm:$0xff]  ;;  %272 = vst [vmem:[%s1329_s6 + $0x60] sm:$0xff] %v271_v12  ;;  %274 = vst [vmem:[%s1329_s6 + $0x68] sm:$0xff] %v273_v13  ;;  %v277_v15 = vld [vmem:[%s1324_s5 + $0xf0] sm:$0xff] }
  0x22   : > { %276 = vst [vmem:[%s1329_s6 + $0x70] sm:$0xff] %v275_v14  ;;  %v279_v16 = vld [vmem:[%s1324_s5 + $0x100] sm:$0xff]  ;;  %v281_v17 = vld [vmem:[%s1324_s5 + $0x110] sm:$0xff]  ;;  %278 = vst [vmem:[%s1329_s6 + $0x78] sm:$0xff] %v277_v15 }
  0x23   : > { %280 = vst [vmem:[%s1329_s6 + $0x80] sm:$0xff] %v279_v16  ;;  %282 = vst [vmem:[%s1329_s6 + $0x88] sm:$0xff] %v281_v17  ;;  %v283_v18 = vld [vmem:[%s1324_s5 + $0x120] sm:$0xff]  ;;  %v285_v19 = vld [vmem:[%s1324_s5 + $0x130] sm:$0xff] }
  0x24   : > { %v287_v20 = vld [vmem:[%s1324_s5 + $0x140] sm:$0xff]  ;;  %284 = vst [vmem:[%s1329_s6 + $0x90] sm:$0xff] %v283_v18  ;;  %286 = vst [vmem:[%s1329_s6 + $0x98] sm:$0xff] %v285_v19  ;;  %v289_v21 = vld [vmem:[%s1324_s5 + $0x150] sm:$0xff] }
  0x25   : > { %288 = vst [vmem:[%s1329_s6 + $0xa0] sm:$0xff] %v287_v20  ;;  %v291_v22 = vld [vmem:[%s1324_s5 + $0x160] sm:$0xff]  ;;  %v293_v23 = vld [vmem:[%s1324_s5 + $0x170] sm:$0xff]  ;;  %290 = vst [vmem:[%s1329_s6 + $0xa8] sm:$0xff] %v289_v21 }
  0x26   : > { %292 = vst [vmem:[%s1329_s6 + $0xb0] sm:$0xff] %v291_v22  ;;  %294 = vst [vmem:[%s1329_s6 + $0xb8] sm:$0xff] %v293_v23  ;;  %v295_v24 = vld [vmem:[%s1324_s5 + $0x180] sm:$0xff]  ;;  %v297_v25 = vld [vmem:[%s1324_s5 + $0x190] sm:$0xff] }
  0x27   : > { %v299_v26 = vld [vmem:[%s1324_s5 + $0x1a0] sm:$0xff]  ;;  %296 = vst [vmem:[%s1329_s6 + $0xc0] sm:$0xff] %v295_v24  ;;  %298 = vst [vmem:[%s1329_s6 + $0xc8] sm:$0xff] %v297_v25  ;;  %v301_v27 = vld [vmem:[%s1324_s5 + $0x1b0] sm:$0xff] }
  0x28   : > { %300 = vst [vmem:[%s1329_s6 + $0xd0] sm:$0xff] %v299_v26  ;;  %v303_v28 = vld [vmem:[%s1324_s5 + $0x1c0] sm:$0xff]  ;;  %v305_v29 = vld [vmem:[%s1324_s5 + $0x1d0] sm:$0xff]  ;;  %302 = vst [vmem:[%s1329_s6 + $0xd8] sm:$0xff] %v301_v27 }
  0x29   : > { %304 = vst [vmem:[%s1329_s6 + $0xe0] sm:$0xff] %v303_v28  ;;  %306 = vst [vmem:[%s1329_s6 + $0xe8] sm:$0xff] %v305_v29  ;;  %v307_v30 = vld [vmem:[%s1324_s5 + $0x1e0] sm:$0xff]  ;;  %v309_v31 = vld [vmem:[%s1324_s5 + $0x1f0] sm:$0xff] }
  0x2a   : > { %308 = vst [vmem:[%s1329_s6 + $0xf0] sm:$0xff] %v307_v30  ;;  %310 = vst [vmem:[%s1329_s6 + $0xf8] sm:$0xff] %v309_v31 }
  0x2b PF: > { %p993_p11 = scmp.ge.s32.totalorder %s1235_s19, 1  ;;  %p315_p12 = scmp.lt.s32.totalorder %s1235_s19, 3 }
  0x2d   : > { %p316_p13 = pnand %p993_p11, %p315_p12 }
  0x2e   : > { %s1395_s7 = sand.u32 (!%p316_p13), 1, %s1219_s15   ;;  %v640_v32 = vlaneseq (!%p316_p13)  ;;  %s1028_s8 = sshll.u32 (!%p316_p13), %s1227_s17, 7  ;;  %v1401_v33 = vld [vmem:[%s1669_s0] sm:$0xff] (!%p316_p13)  ;;  %v1237_v34 = vmov (!%p316_p13), 0.0  }
  0x2f   : > { %319 = sbr.rel (%p316_p13) target bundleno = 401 (0x191), region = 66  ;;  %s994_s11 = sshll.u32 (!%p316_p13), %s1395_s7, 8  ;;  %350 = vst [vmem:[#allocation2] sm:$0xf] (!%p316_p13), %v1237_v34  ;;  %v814_v35 = vcombine.high (!%p316_p13), %v1401_v33, %v1401_v33  ;;  %v709_v40 = vstv (!%p316_p13), %s1028_s8 }
  0x30   : > { %v1407_v36 = vshrl.u32 (!%p316_p13), %v640_v32, 7  ;;  %s1409_s12 = scalar_lea.vmem (!%p316_p13), [#allocation4], %s994_s11  ;;  %v708_v39 = vand.u32 (!%p316_p13), 127, %v640_v32  ;;  %s892_s13 = sld [smem:[#allocation3]] (!%p316_p13) }
  0x31   : > { %v367_v37 = vld [vmem:[%s1409_s12 + $0x80] sm:$0xff] (!%p316_p13)  ;;  %v368_v38 = vld [vmem:[%s1409_s12 + $0x88] sm:$0xff] (!%p316_p13)  ;;  %880 = vmatprep.mubr.f32.mxu0 (!%p316_p13), %v814_v35  ;;  %v369_v4 = vld [vmem:[%s1409_s12 + $0x90] sm:$0xff] (!%p316_p13)  ;;  %s995_s2 = sshll.u32 (!%p316_p13), %s1395_s7, 2  ;;  %s1030_s20 = sshll.u32 (!%p316_p13), %s1227_s17, 6 }
  0x32   : > { %vm399_vm0 = vcmp.gt.f32.partialorder (!%p316_p13), %v367_v37, 0.0  ;;  %vm400_vm1 = vcmp.gt.f32.partialorder (!%p316_p13), %v368_v38, 0.0  ;;  %vm431_vm2 = vcmp.lt.f32.partialorder (!%p316_p13), %v367_v37, 0.0  ;;  %vm432_vm3 = vcmp.lt.f32.partialorder (!%p316_p13), %v368_v38, 0.0  ;;  %v351_v41 = vld [vmem:[%s1409_s12] sm:$0xff] (!%p316_p13)  ;;  %v352_v53 = vld [vmem:[%s1409_s12 + $0x8] sm:$0xff] (!%p316_p13)  ;;  %s1620_s29 = scalar_lea.hbm (!%p316_p13), %s1672_s3, %s1030_s20 }
  0x33   : > { %v463_v42 = vsel (!%p316_p13), %vm431_vm2, -1.0, %v1237_v34  ;;  %v464_v43 = vsel (!%p316_p13), %vm432_vm3, -1.0, %v1237_v34  ;;  %v527_v44 = vand.u32 (!%p316_p13), 2147483647, %v367_v37  ;;  %v528_v45 = vand.u32 (!%p316_p13), 2147483647, %v368_v38 }
  0x34   : > { %v495_v46 = vsel (!%p316_p13), %vm399_vm0, 1.0, %v463_v42  ;;  %v496_v47 = vsel (!%p316_p13), %vm400_vm1, 1.0, %v464_v43  ;;  %v657_v48 = vadd.s32 (!%p316_p13), 128, %v1407_v36  ;;  %v658_v49 = vadd.s32 (!%p316_p13), 136, %v1407_v36  ;;  %v370_v5 = vld [vmem:[%s1409_s12 + $0x98] sm:$0xff] (!%p316_p13)  ;;  %v353_v25 = vld [vmem:[%s1409_s12 + $0x10] sm:$0xff] (!%p316_p13) }
  0x35   : > { %v1012_v50 = vadd.f32 (!%p316_p13), -0.0019607844, %v527_v44  ;;  %v1013_v51 = vadd.f32 (!%p316_p13), -0.0019607844, %v528_v45  ;;  %v1418_v52 = vadd.s32 (!%p316_p13), %v709_v40, %v708_v39  ;;  %vm383_vm4 = vcmp.gt.f32.partialorder (!%p316_p13), %v351_v41, 0.0  ;;  %v354_v26 = vld [vmem:[%s1409_s12 + $0x18] sm:$0xff] (!%p316_p13) }
  0x36   : > { %vm384_vm5 = vcmp.gt.f32.partialorder %v352_v53, 0.0  ;;  %vm415_vm6 = vcmp.lt.f32.partialorder %v351_v41, 0.0  ;;  %vm416_vm7 = vcmp.lt.f32.partialorder %v352_v53, 0.0  ;;  %v511_v54 = vand.u32 2147483647, %v351_v41  ;;  %v371_v44 = vld [vmem:[%s1409_s12 + $0xa0] sm:$0xff] }
  0x37   : > { %v591_v55 = vmax.f32 %v1012_v50, 0.0  ;;  %v592_v56 = vmax.f32 %v1013_v51, 0.0  ;;  %vm727_vm8 = vcmp.eq.s32.totalorder %v657_v48, %v1418_v52  ;;  %vm728_vm9 = vcmp.eq.s32.totalorder %v658_v49, %v1418_v52  ;;  %v372_v45 = vld [vmem:[%s1409_s12 + $0xa8] sm:$0xff]  ;;  %s344_s22 = scalar_lea.vmem [#allocation5], %s995_s2  ;;  %s897_s30 = scalar_lea.sflag [#allocation6], %s1395_s7 }
  0x38   : > { %v447_v57 = vsel %vm415_vm6, -1.0, %v1237_v34  ;;  %v448_v58 = vsel %vm416_vm7, -1.0, %v1237_v34  ;;  %v512_v59 = vand.u32 2147483647, %v352_v53  ;;  %v996_v60 = vadd.f32 -0.0019607844, %v511_v54 }
  0x39   : > { %v623_v61 = vmul.f32 %v591_v55, %v495_v46  ;;  %v624_v62 = vmul.f32 %v592_v56, %v496_v47  ;;  %v479_v63 = vsel %vm383_vm4, 1.0, %v447_v57  ;;  %v480_v0 = vsel %vm384_vm5, 1.0, %v448_v58  ;;  %s910_s24 = sshll.u32 %s344_s22, 4  ;;  %s1238_s17 = smov [#allocation5]   ;;  %s1622_s24 = int_to_ptr.vmem [resolvable:$true] %s910_s24 }
  0x3a   : > { %v997_v1 = vadd.f32 -0.0019607844, %v512_v59  ;;  %v575_v2 = vmax.f32 %v996_v60, 0.0  ;;  %v642_v3 = vadd.s32 8, %v1407_v36  ;;  %vm711_vm10 = vcmp.eq.s32.totalorder %v1407_v36, %v1418_v52  ;;  %s1157_s4 = scalar_lea.vmem %s1622_s24, 64  ;;  %s1161_s5 = sshll.u32 %s1238_s17, 4  ;;  %s1162_s5 = int_to_ptr.vmem [resolvable:$false] %s1161_s5 }
  0x3b   : > { %v759_v6 = vsub.f32 0.0, %v623_v61  ;;  %v760_v7 = vsub.f32 0.0, %v624_v62  ;;  %vm401_vm11 = vcmp.gt.f32.partialorder %v369_v4, 0.0  ;;  %vm402_vm12 = vcmp.gt.f32.partialorder %v370_v5, 0.0  ;;  %p1158_p0 = scmp.ne.s32.totalorder %s1622_s24, %s1157_s4  ;;  %s1163_s6 = scalar_lea.vmem %s1162_s5, 128 }
  0x3c   : > { %v576_v8 = vmax.f32 %v997_v1, 0.0  ;;  %v607_v9 = vmul.f32 %v575_v2, %v479_v63  ;;  %vm712_vm13 = vcmp.eq.s32.totalorder %v642_v3, %v1418_v52  ;;  %vm433_vm14 = vcmp.lt.f32.partialorder %v369_v4, 0.0  ;;  %p1164_p3 = scmp.lt.s32.totalorder %s1622_s24, %s1162_s5  ;;  %p1165_p4 = scmp.lt.s32.totalorder %s1163_s6, %s1157_s4 }
  0x3d   : > { %v791_v10 = vsel %vm727_vm8, 1.0, %v759_v6  ;;  %v792_v11 = vsel %vm728_vm9, 1.0, %v760_v7  ;;  %vm434_vm15 = vcmp.lt.f32.partialorder %v370_v5, 0.0  ;;  %v465_v12 = vsel %vm433_vm14, -1.0, %v1237_v34  ;;  %v356_v6 = vld [vmem:[%s1409_s12 + $0x28] sm:$0xff]  ;;  %p1159_p1 = pnand %p1158_p0, %p1301_p5 }
  0x3e   : > { %v1068_v13 = vpack.c.bf16 %v792_v11, %v791_v10  ;;  %v608_v14 = vmul.f32 %v576_v8, %v480_v0  ;;  %v743_v15 = vsub.f32 0.0, %v607_v9  ;;  %v466_v16 = vsel %vm434_vm15, -1.0, %v1237_v34  ;;  %p1166_p6 = por %p1165_p4, %p1164_p3 }
  0x3f   : > { %v497_v17 = vsel %vm401_vm11, 1.0, %v465_v12  ;;  %v498_v18 = vsel %vm402_vm12, 1.0, %v466_v16  ;;  %v529_v19 = vand.u32 2147483647, %v369_v4  ;;  %v530_v20 = vand.u32 2147483647, %v370_v5  ;;  %p1160_p2 = pneg %p1159_p1 }
  0x40   : > { %1069 = vmatprep.subr.bf16.mxu0 %v1068_v13  ;;  %v744_v21 = vsub.f32 0.0, %v608_v14  ;;  %v775_v22 = vsel %vm711_vm10, 1.0, %v743_v15  ;;  %v659_v23 = vadd.s32 144, %v1407_v36  ;;  %v660_v24 = vadd.s32 152, %v1407_v36  ;;  %v355_v5 = vld [vmem:[%s1409_s12 + $0x20] sm:$0xff] }
  0x41   : > { %v1014_v27 = vadd.f32 -0.0019607844, %v529_v19  ;;  %v1015_v28 = vadd.f32 -0.0019607844, %v530_v20  ;;  %vm385_vm0 = vcmp.gt.f32.partialorder %v353_v25, 0.0  ;;  %vm386_vm1 = vcmp.gt.f32.partialorder %v354_v26, 0.0  ;;  %p1167_p7 = pnand %p1166_p6, %p1160_p2 }
  0x42   : > { %v776_v29 = vsel %vm712_vm13, 1.0, %v744_v21  ;;  %vm729_vm2 = vcmp.eq.s32.totalorder %v659_v23, %v1418_v52  ;;  %vm730_vm3 = vcmp.eq.s32.totalorder %v660_v24, %v1418_v52  ;;  %vm417_vm4 = vcmp.lt.f32.partialorder %v353_v25, 0.0 }
  0x43   : > { %v1070_v30 = vpack.c.bf16 %v776_v29, %v775_v22  ;;  %v593_v31 = vmax.f32 %v1014_v27, 0.0  ;;  %v594_v32 = vmax.f32 %v1015_v28, 0.0  ;;  %vm418_vm5 = vcmp.lt.f32.partialorder %v354_v26, 0.0  ;;  %v373_v29 = vld [vmem:[%s1409_s12 + $0xb0] sm:$0xff] }
  0x44   : > { %v449_v35 = vsel %vm417_vm4, -1.0, %v1237_v34  ;;  %v450_v37 = vsel %vm418_vm5, -1.0, %v1237_v34  ;;  %v513_v38 = vand.u32 2147483647, %v353_v25  ;;  %v514_v39 = vand.u32 2147483647, %v354_v26 }
  0x45   : > { %1071 = vmatpush3.bf16.msra.mxu0 %v1070_v30  ;;  %v625_v40 = vmul.f32 %v593_v31, %v497_v17  ;;  %v626_v41 = vmul.f32 %v594_v32, %v498_v18  ;;  %v481_v42 = vsel %vm385_vm0, 1.0, %v449_v35  ;;  %v482_v43 = vsel %vm386_vm1, 1.0, %v450_v37  ;;  %v374_v30 = vld [vmem:[%s1409_s12 + $0xb8] sm:$0xff] }
  0x46   : > { %v998_v46 = vadd.f32 -0.0019607844, %v513_v38  ;;  %v999_v47 = vadd.f32 -0.0019607844, %v514_v39  ;;  %v643_v48 = vadd.s32 16, %v1407_v36  ;;  %v644_v49 = vadd.s32 24, %v1407_v36 }
  0x47   : > { %v761_v50 = vsub.f32 0.0, %v625_v40  ;;  %v762_v51 = vsub.f32 0.0, %v626_v41  ;;  %vm403_vm6 = vcmp.gt.f32.partialorder %v371_v44, 0.0  ;;  %vm404_vm7 = vcmp.gt.f32.partialorder %v372_v45, 0.0 }
  0x48   : > { %v577_v53 = vmax.f32 %v998_v46, 0.0  ;;  %v578_v54 = vmax.f32 %v999_v47, 0.0  ;;  %vm713_vm8 = vcmp.eq.s32.totalorder %v643_v48, %v1418_v52  ;;  %vm714_vm9 = vcmp.eq.s32.totalorder %v644_v49, %v1418_v52  ;;  %v357_v48 = vld [vmem:[%s1409_s12 + $0x30] sm:$0xff] }
  0x49   : > { %v793_v55 = vsel %vm729_vm2, 1.0, %v761_v50  ;;  %v794_v56 = vsel %vm730_vm3, 1.0, %v762_v51  ;;  %vm435_vm10 = vcmp.lt.f32.partialorder %v371_v44, 0.0  ;;  %vm436_vm11 = vcmp.lt.f32.partialorder %v372_v45, 0.0 }
  0x4a   : > { %v1072_v57 = vpack.c.bf16 %v794_v56, %v793_v55  ;;  %v609_v58 = vmul.f32 %v577_v53, %v481_v42  ;;  %v610_v59 = vmul.f32 %v578_v54, %v482_v43  ;;  %v467_v60 = vsel %vm435_vm10, -1.0, %v1237_v34 }
  0x4b   : > { %v468_v61 = vsel %vm436_vm11, -1.0, %v1237_v34  ;;  %v499_v62 = vsel %vm403_vm6, 1.0, %v467_v60  ;;  %v531_v63 = vand.u32 2147483647, %v371_v44  ;;  %v532_v0 = vand.u32 2147483647, %v372_v45 }
  0x4c   : > { %1073 = vmatprep.subr.bf16.mxu0 %v1072_v57  ;;  %v745_v1 = vsub.f32 0.0, %v609_v58  ;;  %v746_v2 = vsub.f32 0.0, %v610_v59  ;;  %v500_v3 = vsel %vm404_vm7, 1.0, %v468_v61  ;;  %v661_v4 = vadd.s32 160, %v1407_v36  ;;  %v358_v60 = vld [vmem:[%s1409_s12 + $0x38] sm:$0xff] }
  0x4d   : > { %v1016_v7 = vadd.f32 -0.0019607844, %v531_v63  ;;  %v1017_v8 = vadd.f32 -0.0019607844, %v532_v0  ;;  %v662_v9 = vadd.s32 168, %v1407_v36  ;;  %vm387_vm12 = vcmp.gt.f32.partialorder %v355_v5, 0.0 }
  0x4e   : > { %v777_v10 = vsel %vm713_vm8, 1.0, %v745_v1  ;;  %v778_v11 = vsel %vm714_vm9, 1.0, %v746_v2  ;;  %vm731_vm13 = vcmp.eq.s32.totalorder %v661_v4, %v1418_v52  ;;  %vm388_vm14 = vcmp.gt.f32.partialorder %v356_v6, 0.0 }
  0x4f   : > { %v1074_v12 = vpack.c.bf16 %v778_v11, %v777_v10  ;;  %v595_v13 = vmax.f32 %v1016_v7, 0.0  ;;  %v596_v14 = vmax.f32 %v1017_v8, 0.0  ;;  %vm732_vm15 = vcmp.eq.s32.totalorder %v662_v9, %v1418_v52  ;;  %v375_v9 = vld [vmem:[%s1409_s12 + $0xc0] sm:$0xff]  ;;  %v376_v10 = vld [vmem:[%s1409_s12 + $0xc8] sm:$0xff] }
  0x50   : > { %vm419_vm0 = vcmp.lt.f32.partialorder %v355_v5, 0.0  ;;  %vm420_vm1 = vcmp.lt.f32.partialorder %v356_v6, 0.0  ;;  %v515_v15 = vand.u32 2147483647, %v355_v5  ;;  %v516_v16 = vand.u32 2147483647, %v356_v6 }
  0x51   : > { %1075 = vmatpush3.bf16.msra.mxu0 %v1074_v12  ;;  %v627_v17 = vmul.f32 %v595_v13, %v499_v62  ;;  %v628_v18 = vmul.f32 %v596_v14, %v500_v3  ;;  %v451_v19 = vsel %vm419_vm0, -1.0, %v1237_v34  ;;  %v452_v20 = vsel %vm420_vm1, -1.0, %v1237_v34 }
  0x52   : > { %v483_v21 = vsel %vm387_vm12, 1.0, %v451_v19  ;;  %v484_v22 = vsel %vm388_vm14, 1.0, %v452_v20  ;;  %v1000_v23 = vadd.f32 -0.0019607844, %v515_v15  ;;  %v1001_v24 = vadd.f32 -0.0019607844, %v516_v16 }
  0x53   : > { %v763_v25 = vsub.f32 0.0, %v627_v17  ;;  %v764_v26 = vsub.f32 0.0, %v628_v18  ;;  %v645_v27 = vadd.s32 32, %v1407_v36  ;;  %v646_v28 = vadd.s32 40, %v1407_v36 }
  0x54   : > { %v579_v31 = vmax.f32 %v1000_v23, 0.0  ;;  %v580_v32 = vmax.f32 %v1001_v24, 0.0  ;;  %vm405_vm2 = vcmp.gt.f32.partialorder %v373_v29, 0.0  ;;  %vm406_vm3 = vcmp.gt.f32.partialorder %v374_v30, 0.0 }
  0x55   : > { %v795_v35 = vsel %vm731_vm13, 1.0, %v763_v25  ;;  %v796_v37 = vsel %vm732_vm15, 1.0, %v764_v26  ;;  %vm715_vm4 = vcmp.eq.s32.totalorder %v645_v27, %v1418_v52  ;;  %vm716_vm5 = vcmp.eq.s32.totalorder %v646_v28, %v1418_v52  ;;  %v359_v25 = vld [vmem:[%s1409_s12 + $0x40] sm:$0xff] }
  0x56   : > { %v1076_v38 = vpack.c.bf16 %v796_v37, %v795_v35  ;;  %v611_v39 = vmul.f32 %v579_v31, %v483_v21  ;;  %v612_v40 = vmul.f32 %v580_v32, %v484_v22  ;;  %vm437_vm6 = vcmp.lt.f32.partialorder %v373_v29, 0.0  ;;  %v360_v35 = vld [vmem:[%s1409_s12 + $0x48] sm:$0xff] }
  0x57   : > { %vm438_vm7 = vcmp.lt.f32.partialorder %v374_v30, 0.0  ;;  %v469_v41 = vsel %vm437_vm6, -1.0, %v1237_v34  ;;  %v533_v42 = vand.u32 2147483647, %v373_v29  ;;  %v534_v43 = vand.u32 2147483647, %v374_v30 }
  0x58   : > { %1077 = vmatprep.subr.bf16.mxu0 %v1076_v38  ;;  %v747_v44 = vsub.f32 0.0, %v611_v39  ;;  %v748_v45 = vsub.f32 0.0, %v612_v40  ;;  %v470_v46 = vsel %vm438_vm7, -1.0, %v1237_v34  ;;  %v501_v47 = vsel %vm405_vm2, 1.0, %v469_v41 }
  0x59   : > { %v502_v49 = vsel %vm406_vm3, 1.0, %v470_v46  ;;  %v1018_v50 = vadd.f32 -0.0019607844, %v533_v42  ;;  %v1019_v51 = vadd.f32 -0.0019607844, %v534_v43  ;;  %v663_v53 = vadd.s32 176, %v1407_v36 }
  0x5a   : > { %v779_v54 = vsel %vm715_vm4, 1.0, %v747_v44  ;;  %v780_v55 = vsel %vm716_vm5, 1.0, %v748_v45  ;;  %v664_v56 = vadd.s32 184, %v1407_v36  ;;  %vm389_vm8 = vcmp.gt.f32.partialorder %v357_v48, 0.0 }
  0x5b   : > { %v1078_v57 = vpack.c.bf16 %v780_v55, %v779_v54  ;;  %v597_v58 = vmax.f32 %v1018_v50, 0.0  ;;  %v598_v59 = vmax.f32 %v1019_v51, 0.0  ;;  %vm733_vm9 = vcmp.eq.s32.totalorder %v663_v53, %v1418_v52  ;;  %v377_v53 = vld [vmem:[%s1409_s12 + $0xd0] sm:$0xff]  ;;  %v378_v54 = vld [vmem:[%s1409_s12 + $0xd8] sm:$0xff] }
  0x5c   : > { %vm734_vm10 = vcmp.eq.s32.totalorder %v664_v56, %v1418_v52  ;;  %vm390_vm11 = vcmp.gt.f32.partialorder %v358_v60, 0.0  ;;  %vm421_vm12 = vcmp.lt.f32.partialorder %v357_v48, 0.0  ;;  %vm422_vm13 = vcmp.lt.f32.partialorder %v358_v60, 0.0 }
  0x5d   : > { %1079 = vmatpush3.bf16.msra.mxu0 %v1078_v57  ;;  %v629_v61 = vmul.f32 %v597_v58, %v501_v47  ;;  %v630_v62 = vmul.f32 %v598_v59, %v502_v49  ;;  %v453_v63 = vsel %vm421_vm12, -1.0, %v1237_v34  ;;  %v454_v0 = vsel %vm422_vm13, -1.0, %v1237_v34 }
  0x5e   : > { %v485_v1 = vsel %vm389_vm8, 1.0, %v453_v63  ;;  %v486_v2 = vsel %vm390_vm11, 1.0, %v454_v0  ;;  %v517_v3 = vand.u32 2147483647, %v357_v48  ;;  %v518_v4 = vand.u32 2147483647, %v358_v60 }
  0x5f   : > { %v765_v5 = vsub.f32 0.0, %v629_v61  ;;  %v766_v6 = vsub.f32 0.0, %v630_v62  ;;  %v647_v7 = vadd.s32 48, %v1407_v36  ;;  %v648_v8 = vadd.s32 56, %v1407_v36 }
  0x60   : > { %v1002_v11 = vadd.f32 -0.0019607844, %v517_v3  ;;  %v1003_v12 = vadd.f32 -0.0019607844, %v518_v4  ;;  %vm407_vm14 = vcmp.gt.f32.partialorder %v375_v9, 0.0  ;;  %vm408_vm15 = vcmp.gt.f32.partialorder %v376_v10, 0.0 }
  0x61   : > { %v797_v13 = vsel %vm733_vm9, 1.0, %v765_v5  ;;  %v798_v14 = vsel %vm734_vm10, 1.0, %v766_v6  ;;  %vm717_vm0 = vcmp.eq.s32.totalorder %v647_v7, %v1418_v52  ;;  %vm718_vm1 = vcmp.eq.s32.totalorder %v648_v8, %v1418_v52 }
  0x62   : > { %v1080_v15 = vpack.c.bf16 %v798_v14, %v797_v13  ;;  %v581_v16 = vmax.f32 %v1002_v11, 0.0  ;;  %v582_v17 = vmax.f32 %v1003_v12, 0.0  ;;  %vm439_vm2 = vcmp.lt.f32.partialorder %v375_v9, 0.0  ;;  %v361_v13 = vld [vmem:[%s1409_s12 + $0x50] sm:$0xff]  ;;  %v362_v14 = vld [vmem:[%s1409_s12 + $0x58] sm:$0xff] }
  0x63   : > { %vm440_vm3 = vcmp.lt.f32.partialorder %v376_v10, 0.0  ;;  %v471_v18 = vsel %vm439_vm2, -1.0, %v1237_v34  ;;  %v535_v19 = vand.u32 2147483647, %v375_v9  ;;  %v536_v20 = vand.u32 2147483647, %v376_v10 }
  0x64   : > { %1081 = vmatprep.subr.bf16.mxu0 %v1080_v15  ;;  %v613_v21 = vmul.f32 %v581_v16, %v485_v1  ;;  %v614_v22 = vmul.f32 %v582_v17, %v486_v2  ;;  %v472_v23 = vsel %vm440_vm3, -1.0, %v1237_v34  ;;  %v503_v24 = vsel %vm407_vm14, 1.0, %v471_v18 }
  0x65   : > { %v504_v26 = vsel %vm408_vm15, 1.0, %v472_v23  ;;  %v1020_v27 = vadd.f32 -0.0019607844, %v535_v19  ;;  %v1021_v28 = vadd.f32 -0.0019607844, %v536_v20  ;;  %v665_v29 = vadd.s32 192, %v1407_v36 }
  0x66   : > { %v749_v30 = vsub.f32 0.0, %v613_v21  ;;  %v750_v31 = vsub.f32 0.0, %v614_v22  ;;  %v666_v32 = vadd.s32 200, %v1407_v36  ;;  %vm391_vm4 = vcmp.gt.f32.partialorder %v359_v25, 0.0 }
  0x67   : > { %v599_v37 = vmax.f32 %v1020_v27, 0.0  ;;  %v600_v38 = vmax.f32 %v1021_v28, 0.0  ;;  %vm735_vm5 = vcmp.eq.s32.totalorder %v665_v29, %v1418_v52  ;;  %vm392_vm6 = vcmp.gt.f32.partialorder %v360_v35, 0.0  ;;  %v379_v29 = vld [vmem:[%s1409_s12 + $0xe0] sm:$0xff] }
  0x68   : > { %v781_v39 = vsel %vm717_vm0, 1.0, %v749_v30  ;;  %v782_v40 = vsel %vm718_vm1, 1.0, %v750_v31  ;;  %vm736_vm7 = vcmp.eq.s32.totalorder %v666_v32, %v1418_v52  ;;  %vm423_vm8 = vcmp.lt.f32.partialorder %v359_v25, 0.0 }
  0x69   : > { %v1082_v41 = vpack.c.bf16 %v782_v40, %v781_v39  ;;  %v631_v42 = vmul.f32 %v599_v37, %v503_v24  ;;  %v632_v43 = vmul.f32 %v600_v38, %v504_v26  ;;  %vm424_vm9 = vcmp.lt.f32.partialorder %v360_v35, 0.0  ;;  %v380_v40 = vld [vmem:[%s1409_s12 + $0xe8] sm:$0xff] }
  0x6a   : > { %v455_v44 = vsel %vm423_vm8, -1.0, %v1237_v34  ;;  %v456_v45 = vsel %vm424_vm9, -1.0, %v1237_v34  ;;  %v519_v46 = vand.u32 2147483647, %v359_v25  ;;  %v520_v47 = vand.u32 2147483647, %v360_v35 }
  0x6b   : > { %1083 = vmatpush3.bf16.msra.mxu0 %v1082_v41  ;;  %v767_v48 = vsub.f32 0.0, %v631_v42  ;;  %v768_v49 = vsub.f32 0.0, %v632_v43  ;;  %v487_v50 = vsel %vm391_vm4, 1.0, %v455_v44  ;;  %v488_v51 = vsel %vm392_vm6, 1.0, %v456_v45 }
  0x6c   : > { %v1004_v55 = vadd.f32 -0.0019607844, %v519_v46  ;;  %v1005_v56 = vadd.f32 -0.0019607844, %v520_v47  ;;  %v649_v57 = vadd.s32 64, %v1407_v36  ;;  %v650_v58 = vadd.s32 72, %v1407_v36 }
  0x6d   : > { %v799_v59 = vsel %vm735_vm5, 1.0, %v767_v48  ;;  %v800_v60 = vsel %vm736_vm7, 1.0, %v768_v49  ;;  %vm409_vm10 = vcmp.gt.f32.partialorder %v377_v53, 0.0  ;;  %vm410_vm11 = vcmp.gt.f32.partialorder %v378_v54, 0.0 }
  0x6e   : > { %v1084_v61 = vpack.c.bf16 %v800_v60, %v799_v59  ;;  %v583_v62 = vmax.f32 %v1004_v55, 0.0  ;;  %v584_v63 = vmax.f32 %v1005_v56, 0.0  ;;  %vm719_vm12 = vcmp.eq.s32.totalorder %v649_v57, %v1418_v52  ;;  %v363_v57 = vld [vmem:[%s1409_s12 + $0x60] sm:$0xff] }
  0x6f   : > { %vm720_vm13 = vcmp.eq.s32.totalorder %v650_v58, %v1418_v52  ;;  %vm441_vm14 = vcmp.lt.f32.partialorder %v377_v53, 0.0  ;;  %vm442_vm15 = vcmp.lt.f32.partialorder %v378_v54, 0.0  ;;  %v537_v0 = vand.u32 2147483647, %v377_v53  ;;  %v364_v58 = vld [vmem:[%s1409_s12 + $0x68] sm:$0xff] }
  0x70   : > { %1085 = vmatprep.subr.bf16.mxu0 %v1084_v61  ;;  %v615_v1 = vmul.f32 %v583_v62, %v487_v50  ;;  %v616_v2 = vmul.f32 %v584_v63, %v488_v51  ;;  %v473_v3 = vsel %vm441_vm14, -1.0, %v1237_v34  ;;  %v474_v4 = vsel %vm442_vm15, -1.0, %v1237_v34 }
  0x71   : > { %v505_v5 = vsel %vm409_vm10, 1.0, %v473_v3  ;;  %v506_v6 = vsel %vm410_vm11, 1.0, %v474_v4  ;;  %v538_v7 = vand.u32 2147483647, %v378_v54  ;;  %v1022_v8 = vadd.f32 -0.0019607844, %v537_v0 }
  0x72   : > { %v751_v9 = vsub.f32 0.0, %v615_v1  ;;  %v752_v10 = vsub.f32 0.0, %v616_v2  ;;  %v667_v11 = vadd.s32 208, %v1407_v36  ;;  %v668_v12 = vadd.s32 216, %v1407_v36 }
  0x73   : > { %v1023_v15 = vadd.f32 -0.0019607844, %v538_v7  ;;  %v601_v16 = vmax.f32 %v1022_v8, 0.0  ;;  %vm393_vm0 = vcmp.gt.f32.partialorder %v361_v13, 0.0  ;;  %vm394_vm1 = vcmp.gt.f32.partialorder %v362_v14, 0.0 }
  0x74   : > { %v783_v17 = vsel %vm719_vm12, 1.0, %v751_v9  ;;  %v784_v18 = vsel %vm720_vm13, 1.0, %v752_v10  ;;  %vm737_vm2 = vcmp.eq.s32.totalorder %v667_v11, %v1418_v52  ;;  %vm738_vm3 = vcmp.eq.s32.totalorder %v668_v12, %v1418_v52 }
  0x75   : > { %v1086_v19 = vpack.c.bf16 %v784_v18, %v783_v17  ;;  %v602_v20 = vmax.f32 %v1023_v15, 0.0  ;;  %v633_v21 = vmul.f32 %v601_v16, %v505_v5  ;;  %vm425_vm4 = vcmp.lt.f32.partialorder %v361_v13, 0.0  ;;  %v381_v17 = vld [vmem:[%s1409_s12 + $0xf0] sm:$0xff]  ;;  %v382_v18 = vld [vmem:[%s1409_s12 + $0xf8] sm:$0xff] }
  0x76   : > { %vm426_vm5 = vcmp.lt.f32.partialorder %v362_v14, 0.0  ;;  %v457_v22 = vsel %vm425_vm4, -1.0, %v1237_v34  ;;  %v521_v23 = vand.u32 2147483647, %v361_v13  ;;  %v522_v24 = vand.u32 2147483647, %v362_v14 }
  0x77   : > { %1087 = vmatpush3.bf16.msra.mxu0 %v1086_v19  ;;  %v634_v25 = vmul.f32 %v602_v20, %v506_v6  ;;  %v769_v26 = vsub.f32 0.0, %v633_v21  ;;  %v458_v27 = vsel %vm426_vm5, -1.0, %v1237_v34  ;;  %v489_v28 = vsel %vm393_vm0, 1.0, %v457_v22 }
  0x78   : > { %v490_v30 = vsel %vm394_vm1, 1.0, %v458_v27  ;;  %v1006_v31 = vadd.f32 -0.0019607844, %v521_v23  ;;  %v1007_v32 = vadd.f32 -0.0019607844, %v522_v24  ;;  %v651_v35 = vadd.s32 80, %v1407_v36 }
  0x79   : > { %v770_v37 = vsub.f32 0.0, %v634_v25  ;;  %v801_v38 = vsel %vm737_vm2, 1.0, %v769_v26  ;;  %v652_v39 = vadd.s32 88, %v1407_v36  ;;  %vm411_vm6 = vcmp.gt.f32.partialorder %v379_v29, 0.0 }
  0x7a   : > { %v585_v41 = vmax.f32 %v1006_v31, 0.0  ;;  %v586_v42 = vmax.f32 %v1007_v32, 0.0  ;;  %vm721_vm7 = vcmp.eq.s32.totalorder %v651_v35, %v1418_v52  ;;  %vm412_vm8 = vcmp.gt.f32.partialorder %v380_v40, 0.0 }
  0x7b   : > { %v802_v43 = vsel %vm738_vm3, 1.0, %v770_v37  ;;  %vm722_vm9 = vcmp.eq.s32.totalorder %v652_v39, %v1418_v52  ;;  %vm443_vm10 = vcmp.lt.f32.partialorder %v379_v29, 0.0  ;;  %vm444_vm11 = vcmp.lt.f32.partialorder %v380_v40, 0.0 }
  0x7c   : > { %v1088_v44 = vpack.c.bf16 %v802_v43, %v801_v38  ;;  %v617_v45 = vmul.f32 %v585_v41, %v489_v28  ;;  %v618_v46 = vmul.f32 %v586_v42, %v490_v30  ;;  %v475_v47 = vsel %vm443_vm10, -1.0, %v1237_v34 }
  0x7d   : > { %v476_v48 = vsel %vm444_vm11, -1.0, %v1237_v34  ;;  %v507_v49 = vsel %vm411_vm6, 1.0, %v475_v47  ;;  %v539_v50 = vand.u32 2147483647, %v379_v29  ;;  %v540_v51 = vand.u32 2147483647, %v380_v40 }
  0x7e   : > { %1089 = vmatprep.subr.bf16.mxu0 %v1088_v44  ;;  %v753_v53 = vsub.f32 0.0, %v617_v45  ;;  %v754_v54 = vsub.f32 0.0, %v618_v46  ;;  %v508_v55 = vsel %vm412_vm8, 1.0, %v476_v48  ;;  %v669_v56 = vadd.s32 224, %v1407_v36  ;;  %v365_v46 = vld [vmem:[%s1409_s12 + $0x70] sm:$0xff]  ;;  %v366_v47 = vld [vmem:[%s1409_s12 + $0x78] sm:$0xff] }
  0x7f   : > { %v1024_v59 = vadd.f32 -0.0019607844, %v539_v50  ;;  %v1025_v60 = vadd.f32 -0.0019607844, %v540_v51  ;;  %v670_v61 = vadd.s32 232, %v1407_v36  ;;  %vm395_vm12 = vcmp.gt.f32.partialorder %v363_v57, 0.0 }
  0x80   : > { %v785_v62 = vsel %vm721_vm7, 1.0, %v753_v53  ;;  %v786_v63 = vsel %vm722_vm9, 1.0, %v754_v54  ;;  %vm739_vm13 = vcmp.eq.s32.totalorder %v669_v56, %v1418_v52  ;;  %vm396_vm14 = vcmp.gt.f32.partialorder %v364_v58, 0.0 }
  0x81   : > { %v1090_v0 = vpack.c.bf16 %v786_v63, %v785_v62  ;;  %v603_v1 = vmax.f32 %v1024_v59, 0.0  ;;  %v604_v2 = vmax.f32 %v1025_v60, 0.0  ;;  %vm740_vm15 = vcmp.eq.s32.totalorder %v670_v61, %v1418_v52 }
  0x82   : > { %vm427_vm0 = vcmp.lt.f32.partialorder %v363_v57, 0.0  ;;  %vm428_vm1 = vcmp.lt.f32.partialorder %v364_v58, 0.0  ;;  %v523_v3 = vand.u32 2147483647, %v363_v57  ;;  %v524_v4 = vand.u32 2147483647, %v364_v58 }
  0x83   : > { %1091 = vmatpush3.bf16.msra.mxu0 %v1090_v0  ;;  %v635_v5 = vmul.f32 %v603_v1, %v507_v49  ;;  %v636_v6 = vmul.f32 %v604_v2, %v508_v55  ;;  %v459_v7 = vsel %vm427_vm0, -1.0, %v1237_v34  ;;  %v460_v8 = vsel %vm428_vm1, -1.0, %v1237_v34 }
  0x84   : > { %v491_v9 = vsel %vm395_vm12, 1.0, %v459_v7  ;;  %v492_v10 = vsel %vm396_vm14, 1.0, %v460_v8  ;;  %v1008_v11 = vadd.f32 -0.0019607844, %v523_v3  ;;  %v1009_v12 = vadd.f32 -0.0019607844, %v524_v4 }
  0x85   : > { %v771_v13 = vsub.f32 0.0, %v635_v5  ;;  %v772_v14 = vsub.f32 0.0, %v636_v6  ;;  %v653_v15 = vadd.s32 96, %v1407_v36  ;;  %v654_v16 = vadd.s32 104, %v1407_v36 }
  0x86   : > { %v587_v19 = vmax.f32 %v1008_v11, 0.0  ;;  %v588_v20 = vmax.f32 %v1009_v12, 0.0  ;;  %vm413_vm2 = vcmp.gt.f32.partialorder %v381_v17, 0.0  ;;  %vm414_vm3 = vcmp.gt.f32.partialorder %v382_v18, 0.0 }
  0x87   : > { %v803_v21 = vsel %vm739_vm13, 1.0, %v771_v13  ;;  %v804_v22 = vsel %vm740_vm15, 1.0, %v772_v14  ;;  %vm723_vm4 = vcmp.eq.s32.totalorder %v653_v15, %v1418_v52  ;;  %vm724_vm5 = vcmp.eq.s32.totalorder %v654_v16, %v1418_v52 }
  0x88   : > { %v1092_v23 = vpack.c.bf16 %v804_v22, %v803_v21  ;;  %v619_v24 = vmul.f32 %v587_v19, %v491_v9  ;;  %v620_v25 = vmul.f32 %v588_v20, %v492_v10  ;;  %vm445_vm6 = vcmp.lt.f32.partialorder %v381_v17, 0.0  ;;  %v812_v10 = vld [vmem:[#allocation2] sm:$0xf] }
  0x89   : > { %vm446_vm7 = vcmp.lt.f32.partialorder %v382_v18, 0.0  ;;  %v477_v26 = vsel %vm445_vm6, -1.0, %v1237_v34  ;;  %v541_v27 = vand.u32 2147483647, %v381_v17  ;;  %v542_v28 = vand.u32 2147483647, %v382_v18 }
  0x8a   : > { %1093 = vmatprep.subr.bf16.mxu0 %v1092_v23  ;;  %v755_v29 = vsub.f32 0.0, %v619_v24  ;;  %v756_v30 = vsub.f32 0.0, %v620_v25  ;;  %v478_v31 = vsel %vm446_vm7, -1.0, %v1237_v34  ;;  %v509_v32 = vsel %vm413_vm2, 1.0, %v477_v26 }
  0x8b   : > { %v510_v35 = vsel %vm414_vm3, 1.0, %v478_v31  ;;  %v1026_v37 = vadd.f32 -0.0019607844, %v541_v27  ;;  %v1027_v38 = vadd.f32 -0.0019607844, %v542_v28  ;;  %v671_v41 = vadd.s32 240, %v1407_v36 }
  0x8c   : > { %v787_v39 = vsel %vm723_vm4, 1.0, %v755_v29  ;;  %v788_v40 = vsel %vm724_vm5, 1.0, %v756_v30  ;;  %v672_v42 = vadd.s32 248, %v1407_v36  ;;  %vm397_vm8 = vcmp.gt.f32.partialorder %v365_v46, 0.0 }
  0x8d   : > { %v1094_v43 = vpack.c.bf16 %v788_v40, %v787_v39  ;;  %v605_v44 = vmax.f32 %v1026_v37, 0.0  ;;  %v606_v45 = vmax.f32 %v1027_v38, 0.0  ;;  %vm398_vm9 = vcmp.gt.f32.partialorder %v366_v47, 0.0 }
  0x8e   : > { %vm429_vm10 = vcmp.lt.f32.partialorder %v365_v46, 0.0  ;;  %vm430_vm11 = vcmp.lt.f32.partialorder %v366_v47, 0.0  ;;  %vm741_vm12 = vcmp.eq.s32.totalorder %v671_v41, %v1418_v52  ;;  %vm742_vm13 = vcmp.eq.s32.totalorder %v672_v42, %v1418_v52 }
  0x8f   : > { %1095 = vmatpush3.bf16.msra.mxu0 %v1094_v43  ;;  %v637_v48 = vmul.f32 %v605_v44, %v509_v32  ;;  %v638_v49 = vmul.f32 %v606_v45, %v510_v35  ;;  %v461_v50 = vsel %vm429_vm10, -1.0, %v1237_v34  ;;  %v462_v51 = vsel %vm430_vm11, -1.0, %v1237_v34 }
  0x90   : > { %v525_v53 = vand.u32 2147483647, %v365_v46  ;;  %v526_v54 = vand.u32 2147483647, %v366_v47  ;;  %v493_v57 = vsel %vm397_vm8, 1.0, %v461_v50  ;;  %v494_v58 = vsel %vm398_vm9, 1.0, %v462_v51 }
  0x91   : > { %v773_v55 = vsub.f32 0.0, %v637_v48  ;;  %v774_v56 = vsub.f32 0.0, %v638_v49  ;;  %v655_v63 = vadd.s32 112, %v1407_v36  ;;  %v656_v0 = vadd.s32 120, %v1407_v36 }
  0x92   : > { %v1010_v59 = vadd.f32 -0.0019607844, %v525_v53  ;;  %v1011_v60 = vadd.f32 -0.0019607844, %v526_v54 }
  0x93   : > { %v805_v61 = vsel %vm741_vm12, 1.0, %v773_v55  ;;  %v806_v62 = vsel %vm742_vm13, 1.0, %v774_v56  ;;  %vm725_vm14 = vcmp.eq.s32.totalorder %v655_v63, %v1418_v52  ;;  %vm726_vm15 = vcmp.eq.s32.totalorder %v656_v0, %v1418_v52 }
  0x94   : > { %v1096_v1 = vpack.c.bf16 %v806_v62, %v805_v61  ;;  %v589_v34 = vmax.f32 %v1010_v59, 0.0  ;;  %v590_v2 = vmax.f32 %v1011_v60, 0.0  ;;  %v893_v52 = vstv %s892_s13 }
  0x96   : > { %1097 = vmatprep.subr.bf16.mxu0 %v1096_v1  ;;  %v621_v3 = vmul.f32 %v589_v34, %v493_v57  ;;  %v622_v4 = vmul.f32 %v590_v2, %v494_v58 }
  0x98   : > { %v757_v5 = vsub.f32 0.0, %v621_v3  ;;  %v758_v6 = vsub.f32 0.0, %v622_v4 }
  0x9a   : > { %v789_v7 = vsel %vm725_vm14, 1.0, %v757_v5  ;;  %v790_v8 = vsel %vm726_vm15, 1.0, %v758_v6 }
  0x9b   : > { %v1098_v9 = vpack.c.bf16 %v790_v8, %v789_v7 }
  0x9d   : > { %1099 = vmatpush3.bf16.msra.mxu0 %v1098_v9 }
  0xa0   : > { %881 = vmatmul.mubr.f32.vlgmr.msra.gmra.mrb[0].mxu0 %v1401_v33 }
 0x173   : > { %v1065_v36 = vpop.f32.mrb[0].mxu0 }
 0x174   : > { %v1066_v11 = vpop.f32.mrb[1].mxu0 }
 0x175   : > { %v1067_v12 = vadd.f32 %v1066_v11, %v1065_v36 }
 0x177   : > { %v886_v13 = vadd.f32 %v1067_v12, %v812_v10 }
 0x179   : > { %887 = vst [vmem:[#allocation2] sm:$0xf] %v886_v13 }
 0x180   : > { %v891_v14 = vld [vmem:[#allocation2] sm:$0xf] }
 0x181   : > { %v894_v15 = vadd.f32 %v893_v52, %v891_v14 }
 0x183   : > { %895 = vst [vmem:[%s344_s22] sm:$0xf] %v894_v15 }
 0x184   : > { %1170 = shalt.err (!%p1167_p7)
}
 0x185   : > { %s1171_s7 = scalar_lea.hbm %s1620_s29, 64  ;;  %s1175_s10 = scalar_lea.hbm %s1672_s3, 128 }
 0x186   : > { %p1172_p8 = scmp.ne.s32.totalorder %s1620_s29, %s1171_s7  ;;  %p1176_p13 = scmp.lt.u32.totalorder %s1620_s29, %s1672_s3 }
 0x187   : > { %p1177_p0 = scmp.lt.u32.totalorder %s1175_s10, %s1171_s7  ;;  %p1179_p2 = scmp.lt.u32.totalorder %s1171_s7, %s1620_s29 }
 0x188   : > { %p1173_p11 = pnand %p1172_p8, %p1301_p5 }
 0x189   : > { %p1178_p1 = por %p1177_p0, %p1176_p13 }
 0x18a   : > { %p1174_p12 = pneg %p1173_p11 }
 0x18b   : > { %p1180_p3 = por %p1179_p2, %p1178_p1 }
 0x18d   : > { %p1181_p4 = pnand %p1180_p3, %p1174_p12 }
 0x18f   : > { %1184 = shalt.err (!%p1181_p4)
}
 0x190   : > { %1100 = dma.vmem_to_hbm [thread:$0]  (%p1301_p5), %s1622_s24, 64, %s1620_s29, %s897_s30  }
 0x191 PF: > { %s922_s13 = sand.u32 1, %s1215_s14   ;;  %p1103_p6 = pnand %p990_p10, %p1312_p9 }
 0x192   : > { %s923_s2 = scalar_lea.sflag [#allocation6], %s922_s13 }
 0x193   : > { %1210 = dma.done.wait (!%p1103_p6), %s923_s2, 64  }
 0x194   : > { %1212 = vsyncadd (!%p1103_p6), %s923_s2, 4294967232  ;;  %s17_s19 = sadd.s32 1, %s1235_s19   ;;  %s1675_s14 = smov %s1219_s15 }
 0x195   : > { %p14_p7 = scmp.ge.s32.totalorder %s17_s19, 4   ;;  %s1676_s15 = smov %s1223_s16 }
 0x196   : > { %s1677_s16 = smov %s1310_s25  ;;  %s1678_s17 = smov %s1231_s18 }
 0x197   : > { %s1679_s18 = smov %s1681_s21  ;;  %16 = sbr.rel (!%p14_p7) target bundleno = 6 (0x6), region = 119 }
 0x19e   :  { %928 = vsyncpa [#allocation6], 1 }
 0x19f   :  { %930 = vsyncpa [#allocation6 + $0x1], 1 }

// kernel: regdiffusion_forward.2
= control target key start
LH: loop header
LB: loop body
LE: loop exit
PB: predicated region body
PF: predicated region fallthrough
CT: control target
= control target key end

     0   :  { %s2509_s18 = smov 0   ;;  %s2511_s19 = smov 0   ;;  %s2936_s0 = inlined_call_operand.vmem [shape: f32[4,256], index: 0, kind: input, shape index: {}]   ;;  %s2937_s1 = inlined_call_operand.vmem [shape: f32[15,256], index: 1, kind: input, shape index: {}]   ;;  %s2938_s2 = inlined_call_operand.vmem [shape: f32[15,4], index: 2, kind: input, shape index: {}]   ;;  %s2939_s3 = inlined_call_operand.vmem [shape: f32[15,4], index: 3, kind: input, shape index: {}]   ;;  %s2940_s4 = inlined_call_operand.vmem [shape: f32[15,1], index: 4, kind: input, shape index: {}]   ;;  %s2941_s5 = inlined_call_operand.vmem [shape: f32[15,15], index: 5, kind: input, shape index: {}]   ;;  %s2942_s6 = inlined_call_operand.vmem [shape: f32[15,1], index: 6, kind: input, shape index: {}]   ;;  %s2943_s7 = inlined_call_operand.vmem [shape: f32[15,15], index: 7, kind: input, shape index: {}]   ;;  %s2944_s8 = inlined_call_operand.vmem [shape: f32[15,1], index: 8, kind: input, shape index: {}]   ;;  %s2945_s9 = inlined_call_operand.vmem [shape: f32[15,15], index: 9, kind: input, shape index: {}]   ;;  %s2946_s10 = inlined_call_operand.vmem [shape: f32[15,1], index: 10, kind: input, shape index: {}]   ;;  %s2947_s11 = inlined_call_operand.vmem [shape: f32[15,1], index: 11, kind: input, shape index: {}]   ;;  %s2948_s12 = inlined_call_operand.vmem [shape: f32[15,15], index: 12, kind: input, shape index: {}]   ;;  %s2949_s13 = inlined_call_operand.vmem [shape: f32[15,1], index: 13, kind: input, shape index: {}]   ;;  %s2950_s14 = inlined_call_operand.vmem [shape: f32[15,1], index: 14, kind: input, shape index: {}]   ;;  %s2951_s15 = inlined_call_operand.vmem [shape: f32[4,256], index: 15, kind: output, shape index: {}]  }
   0x1   :  { %s2513_s20 = smov 0  }
   0x2 LB: > { %s2015_s21 = sadd.s32 4294967295, %s2422_s20   ;;  %s2526_s22 = sadd.s32 1, %s2422_s20   ;;  %s2422_s20 = sphi %s2513_s20, %s2956_s20   ;;  %s2418_s19 = sphi %s2511_s19, %s2955_s19   ;;  %s2414_s18 = sphi %s2509_s18, %s2954_s18  }
   0x3   : > { %s55_s23 = ssub.s32 %s2422_s20, %s2526_s22  ;;  %s58_s24 = sadd.s32 1, %s2418_s19 }
   0x4   : > { %p56_p0 = scmp.eq.s32.totalorder %s55_s23, 0  ;;  %p65_p1 = scmp.ne.s32.totalorder %s2418_s19, %s2414_s18 }
   0x5   : > { %p66_p2 = scmp.eq.s32.totalorder %s2422_s20, 0  ;;  %p2018_p4 = scmp.ge.s32.totalorder %s2422_s20, 2 }
   0x6   : > { %s2535_s25 = scalar_select %p56_p0, %s2418_s19, %s58_s24  }
   0x7   : > { %p67_p3 = por %p66_p2, %p65_p1  ;;  %429 = sbr.rel (%p2018_p4) target bundleno = 21 (0x15), region = 68 }
   0xe   : > { %439 = sbr.rel (!%p67_p3) target bundleno = 21 (0x15), region = 76  ;;  %s441_s26 = sand.u32 (%p67_p3), 1, %s2418_s19  }
   0xf   : > { %s2020_s27 = sshll.u32 (%p67_p3), %s2422_s20, 3  ;;  %s2019_s28 = sshll.u32 (%p67_p3), %s441_s26, 4 }
  0x10   : > { %s445_s16 = scalar_lea.vmem (%p67_p3), %s2937_s1, %s2020_s27  ;;  %s443_s17 = scalar_lea.vmem (%p67_p3), [#allocation2], %s2019_s28 }
  0x11   : > { %v475_v0 = vld [vmem:[%s445_s16] sm:$0xff] (%p67_p3)  ;;  %v477_v1 = vld [vmem:[%s445_s16 + $0x10] sm:$0xff] (%p67_p3) }
  0x12   : > { %476 = vst [vmem:[%s443_s17] sm:$0xff] (%p67_p3), %v475_v0  ;;  %478 = vst [vmem:[%s443_s17 + $0x8] sm:$0xff] (%p67_p3), %v477_v1 }
  0x15 PF: > { %p2021_p5 = scmp.ge.s32.totalorder %s2422_s20, 1  ;;  %p483_p6 = scmp.lt.s32.totalorder %s2422_s20, 3 }
  0x17   : > { %p484_p7 = pnand %p2021_p5, %p483_p6 }
  0x18   : > { %s490_s23 = sand.u32 (!%p484_p7), 1, %s2414_s18   ;;  %vm581_vm0 = vcmask (!%p484_p7), 1046528   ;;  %v572_v2 = vld [vmem:[%s2941_s5] sm:$0xff] (!%p484_p7)  ;;  %vm574_vm1 = vcmask (!%p484_p7), 121856   ;;  %v2424_v3 = vmov (!%p484_p7), 0   ;;  %vm2425_vm2 = vmmov (!%p484_p7), 1  }
  0x19   : > { %487 = sbr.rel (%p484_p7) target bundleno = 1704 (0x6a8), region = 114  ;;  %s2022_s27 = sshll.u32 (!%p484_p7), %s490_s23, 4  ;;  %2122 = vmatprep.mubr.msk.f32.mxu0 (!%p484_p7), %vm574_vm1, %v572_v2  ;;  %2317 = vset.pattern.permute.xlu1 (!%p484_p7), %v2424_v3  ;;  %v554_v4 = vld [vmem:[%s2942_s6] sm:$0xff] (!%p484_p7)  ;;  %vm2555_vm3 = vmpackc.low (!%p484_p7), %vm581_vm0, %vm2425_vm2  ;;  %v555_v9 = vld [vmem:[%s2942_s6 + $0x8] sm:$0x7f] (!%p484_p7)  ;;  %v2426_v18 = vmov (!%p484_p7), 1   ;;  %v670_v30 = vlaneseq (!%p484_p7) }
  0x1a   : > { %680 = vperm.xlu1 (!%p484_p7), %2317, %v554_v4   ;;  %2316 = vset.pattern.permute.xlu0 (!%p484_p7), %v2424_v3  ;;  %v552_v6 = vld [vmem:[%s2940_s4] sm:$0xff] (!%p484_p7)  ;;  %s492_s16 = scalar_lea.vmem (!%p484_p7), [#allocation2], %s2022_s27  ;;  %v553_v11 = vld [vmem:[%s2940_s4 + $0x8] sm:$0x7f] (!%p484_p7)  ;;  %v2427_v25 = vmov (!%p484_p7), 2   ;;  %v2428_v27 = vmov (!%p484_p7), 3  }
  0x1b   : > { %v550_v7 = vld [vmem:[%s492_s16] sm:$0xff] (!%p484_p7)  ;;  %v551_v8 = vld [vmem:[%s492_s16 + $0x8] sm:$0x7f] (!%p484_p7)  ;;  %662 = vperm.xlu0 (!%p484_p7), %2316, %v552_v6   ;;  %p540_p8 = scmp.lt.s32.totalorder (!%p484_p7), %s2015_s21, 1  ;;  %v2646_v32 = vshrl.u32 (!%p484_p7), %v670_v30, 7 }
  0x1c   : > { %v2209_v10 = vpack.c.bf16 (!%p484_p7), %v551_v8, %v550_v7  ;;  %v573_v12 = vld [vmem:[%s2941_s5 + $0x8] sm:$0x7f] (!%p484_p7)  ;;  %v692_v14 = vld [vmem:[%s2938_s2] sm:$0xff] (!%p484_p7) }
  0x1d   : > { %v693_v13 = vld [vmem:[%s2938_s2 + $0x8] sm:$0x7f] (!%p484_p7)  ;;  %v558_v16 = vld [vmem:[%s2944_s8] sm:$0xff] (!%p484_p7)  ;;  %v1049_v33 = vsub.s32 (!%p484_p7), 1, %v2646_v32  ;;  %v1348_v34 = vsub.s32 (!%p484_p7), 2, %v2646_v32  ;;  %v1647_v35 = vsub.s32 (!%p484_p7), 3, %v2646_v32 }
  0x1e   : > { %2211 = vmatprep.subr.msk.bf16.mxu0 (!%p484_p7), %vm2555_vm3, %v2209_v10  ;;  %685 = vperm.xlu1 (!%p484_p7), %2317, %v555_v9   ;;  %v559_v15 = vld [vmem:[%s2944_s8 + $0x8] sm:$0x7f] (!%p484_p7)  ;;  %v562_v19 = vld [vmem:[%s2946_s10] sm:$0xff] (!%p484_p7)  ;;  %v672_v56 = vsub.s32 (!%p484_p7), 0, %v2646_v32 }
  0x1f   : > { %2214 = vmatpush3.bf16.msk.msra.mxu0 (!%p484_p7), %vm2555_vm3, %v2209_v10  ;;  %667 = vperm.xlu0 (!%p484_p7), %2316, %v553_v11   ;;  %v1060_v17 = vld [vmem:[%s2938_s2 + $0x8] sm:$0x7f] (!%p484_p7)  ;;  %v564_v21 = vld [vmem:[%s2947_s11] sm:$0xff] (!%p484_p7) }
  0x20   : > { %v563_v20 = vld [vmem:[%s2946_s10 + $0x8] sm:$0x7f]  ;;  %v2606_v22 = vld [vmem:[%s2939_s3] sm:$0xff]  ;;  %s2958_s21 = smov (!%p540_p8, %s2015_s21), 1 }
  0x21   : > { %v565_v23 = vld [vmem:[%s2947_s11 + $0x8] sm:$0x7f]  ;;  %s2023_s24 = sshll.u32 %s2958_s21, 2  ;;  %v2644_v31 = vld [vmem:[%s2943_s7] sm:$0xff] }
  0x22   : > { %2123 = vmatmul.mubr.msk.f32.vlgmr.msra.gmra.mrb[0].mxu0 %vm574_vm1, %v573_v12  ;;  %701 = vperm.xlu1 %2317, %v693_v13   ;;  %v917_v24 = vld [vmem:[%s2939_s3 + $0x8] sm:$0x7f]  ;;  %s543_s28 = scalar_lea.vmem %s2936_s0, %s2023_s24  ;;  %s2845_s27 = scalar_lea.vmem %s2951_s15, %s2023_s24 }
  0x23   : > { %696 = vperm.xlu0 %2316, %v692_v14   ;;  %v1359_v26 = vld [vmem:[%s2938_s2 + $0x8] sm:$0x7f]  ;;  %v2638_v29 = vld [vmem:[%s543_s28] sm:$0xf]  ;;  %2129 = vmatprep.mubr.msk.f32.mxu1 %vm574_vm1, %v2644_v31 }
  0x24   : > { %v1658_v28 = vld [vmem:[%s2938_s2 + $0x8] sm:$0x7f]  ;;  %2334 = vtanh.f32 %v2638_v29 }
  0x26   : > { %713 = vperm.xlu1 %2317, %v559_v15  }
  0x27   : > { %708 = vperm.xlu0 %2316, %v558_v16  }
  0x2a   : > { %2319 = vset.pattern.permute.xlu1 %v2426_v18 }
  0x2b   : > { %1068 = vperm.xlu1 %2319, %v1060_v17   ;;  %2318 = vset.pattern.permute.xlu0 %v2426_v18 }
  0x2c   : > { %1063 = vperm.xlu0 %2318, %v692_v14  }
  0x2e   : > { %v2335_v36 = vpop.eup %2334 }
  0x2f   : > { %2320 = vset.pattern.permute.xlu1 %v2424_v3  ;;  %v1050_v37 = vrot.slane %v2335_v36, %v1049_v33  ;;  %v1349_v38 = vrot.slane %v2335_v36, %v1348_v34  ;;  %v1648_v39 = vrot.slane %v2335_v36, %v1647_v35  ;;  %v673_v59 = vrot.slane %v2335_v36, %v672_v56 }
  0x30   : > { %804 = vperm.xlu1 %2320, %v562_v19   ;;  %2321 = vset.pattern.permute.xlu0 %v2424_v3 }
  0x31   : > { %809 = vperm.xlu0 %2321, %v563_v20  }
  0x34   : > { %904 = vperm.xlu1 %2320, %v564_v21  }
  0x35   : > { %920 = vperm.xlu0 %2321, %v2606_v22  }
  0x38   : > { %909 = vperm.xlu1 %2320, %v565_v23  }
  0x39   : > { %2322 = vset.pattern.permute.xlu0 %v2427_v25 }
  0x3a   : > { %1362 = vperm.xlu0 %2322, %v692_v14  }
  0x3c   : > { %925 = vperm.xlu1 %2320, %v917_v24  }
  0x3e   : > { %2325 = vset.pattern.permute.xlu0 %v2426_v18 }
  0x40   : > { %2323 = vset.pattern.permute.xlu1 %v2427_v25 }
  0x41   : > { %1367 = vperm.xlu1 %2323, %v1359_v26  }
  0x45   : > { %2324 = vset.pattern.permute.xlu1 %v2426_v18 }
  0x46   : > { %1245 = vperm.xlu1 %2324, %v2606_v22  }
  0x4a   : > { %2326 = vset.pattern.permute.xlu1 %v2428_v27 }
  0x4b   : > { %1661 = vperm.xlu1 %2326, %v692_v14  }
  0x4f   : > { %1666 = vperm.xlu1 %2326, %v1658_v28  }
  0x53   : > { %2328 = vset.pattern.permute.xlu1 %v2427_v25 }
  0x99   : > { %v681_v48 = vpop.permute.xlu1 %680 }
  0x9a   : > { %v663_v40 = vpop.permute.xlu0 %662 }
  0x9b   : > { %v1051_v41 = vmul.f32 %v1050_v37, %v663_v40  ;;  %v1350_v42 = vmul.f32 %v1349_v38, %v663_v40  ;;  %v1649_v43 = vmul.f32 %v1648_v39, %v663_v40  ;;  %v674_v62 = vmul.f32 %v673_v59, %v663_v40 }
  0x9d   : > { %v686_v49 = vpop.permute.xlu1 %685 }
  0x9e   : > { %v668_v44 = vpop.permute.xlu0 %667 }
  0x9f   : > { %v1052_v45 = vmul.f32 %v1050_v37, %v668_v44  ;;  %v1351_v46 = vmul.f32 %v1349_v38, %v668_v44  ;;  %v1650_v47 = vmul.f32 %v1648_v39, %v668_v44  ;;  %v675_v61 = vmul.f32 %v673_v59, %v668_v44 }
  0xa1   : > { %v702_v50 = vpop.permute.xlu1 %701 }
  0xa2   : > { %v697_v57 = vpop.permute.xlu0 %696 }
  0xa5   : > { %v2659_v51 = vpop.permute.xlu1 %713 }
  0xa6   : > { %v2672_v60 = vpop.permute.xlu0 %708 }
  0xaa   : > { %v1069_v52 = vpop.permute.xlu1 %1068 }
  0xab   : > { %v1064_v8 = vpop.permute.xlu0 %1063 }
  0xaf   : > { %v2661_v53 = vpop.permute.xlu1 %804 }
  0xb0   : > { %v2676_v21 = vpop.permute.xlu0 %809 }
  0xb3   : > { %v2663_v54 = vpop.permute.xlu1 %904 }
  0xb4   : > { %v2678_v26 = vpop.permute.xlu0 %920 }
  0xb7   : > { %v2665_v55 = vpop.permute.xlu1 %909 }
  0xbb   : > { %v2668_v58 = vpop.permute.xlu1 %925 }
  0xc0   : > { %v1368_v0 = vpop.permute.xlu1 %1367 }
  0xc5   : > { %v2674_v19 = vpop.permute.xlu1 %1245 }
  0xca   : > { %v1662_v24 = vpop.permute.xlu1 %1661 }
  0xce   : > { %v1667_v38 = vpop.permute.xlu1 %1666 }
  0xf5   : > { %v2124_v63 = vpop.f32.mrb[0].mxu0 }
  0xf6   : > { %v677_v1 = vadd.f32 %v2124_v63, %v675_v61  ;;  %v1054_v2 = vadd.f32 %v2124_v63, %v1052_v45  ;;  %v1353_v4 = vadd.f32 %v2124_v63, %v1351_v46  ;;  %v1652_v6 = vadd.f32 %v2124_v63, %v1650_v47  ;;  %v651_v7 = vpop.f32.mrb[1].mxu0 }
  0xf7   : > { %v676_v9 = vadd.f32 %v674_v62, %v651_v7  ;;  %v1053_v10 = vadd.f32 %v1051_v41, %v651_v7  ;;  %v1352_v11 = vadd.f32 %v1350_v42, %v651_v7  ;;  %v1651_v12 = vadd.f32 %v1649_v43, %v651_v7  ;;  %v1363_v42 = vpop.permute.xlu0 %1362 }
  0xf8   : > { %v689_v13 = vadd.f32 %v686_v49, %v677_v1  ;;  %v1056_v14 = vadd.f32 %v1054_v2, %v686_v49  ;;  %v1355_v15 = vadd.f32 %v1353_v4, %v686_v49  ;;  %v1654_v16 = vadd.f32 %v1652_v6, %v686_v49 }
  0xf9   : > { %v688_v17 = vadd.f32 %v681_v48, %v676_v9  ;;  %v1055_v18 = vadd.f32 %v1053_v10, %v681_v48  ;;  %v1354_v20 = vadd.f32 %v1352_v11, %v681_v48  ;;  %v1653_v23 = vadd.f32 %v1651_v12, %v681_v48  ;;  %v2711_v10 = vld [vmem:[%s2945_s9 + $0x8] sm:$0x7f]  ;;  %v2726_v11 = vld [vmem:[%s2948_s12] sm:$0xff] }
  0xfa   : > { %2336 = vtanh.f32 %v689_v13  ;;  %v1541_v12 = vld [vmem:[%s2939_s3 + $0x8] sm:$0x7f] }
  0xfb   : > { %2338 = vtanh.f32 %v1056_v14  ;;  %v1242_v13 = vld [vmem:[%s2939_s3 + $0x8] sm:$0x7f]  ;;  %1549 = vperm.xlu1 %2328, %v1541_v12  }
  0xfc   : > { %2340 = vtanh.f32 %v1355_v15  ;;  %1250 = vperm.xlu0 %2325, %v1242_v13   ;;  %v569_v14 = vld [vmem:[%s2949_s13 + $0x8] sm:$0x7f] }
  0xfd   : > { %2342 = vtanh.f32 %v1654_v16  ;;  %v1840_v15 = vld [vmem:[%s2939_s3 + $0x8] sm:$0x7f]  ;;  %v570_v16 = vld [vmem:[%s2950_s14] sm:$0xff] }
  0xfe   : > { %2344 = vtanh.f32 %v688_v17  ;;  %v815_v17 = vrot.slane %v2638_v29, %v672_v56 }
  0xff   : > { %2346 = vtanh.f32 %v1055_v18  ;;  %2329 = vset.pattern.permute.xlu1 %v2428_v27 }
 0x100   : > { %2348 = vtanh.f32 %v1354_v20  ;;  %2327 = vset.pattern.permute.xlu0 %v2427_v25  ;;  %1843 = vperm.xlu1 %2329, %v2606_v22   ;;  %v568_v25 = vld [vmem:[%s2949_s13] sm:$0xff]  ;;  %v817_v18 = vmul.f32 %v815_v17, %v2676_v21 }
 0x101   : > { %2350 = vtanh.f32 %v1653_v23  ;;  %1544 = vperm.xlu0 %2327, %v2606_v22   ;;  %v571_v22 = vld [vmem:[%s2950_s14 + $0x8] sm:$0x7f]  ;;  %v816_v23 = vmul.f32 %v815_v17, %v2661_v53 }
 0x104   : > { %v2337_v28 = vpop.eup %2336  ;;  %2331 = vset.pattern.permute.xlu1 %v2424_v3 }
 0x105   : > { %v2339_v30 = vpop.eup %2338  ;;  %v705_v39 = vadd.f32 %v2337_v28, %v702_v50  ;;  %2330 = vset.pattern.permute.xlu0 %v2428_v27  ;;  %937 = vperm.xlu1 %2331, %v569_v14  }
 0x106   : > { %v2341_v36 = vpop.eup %2340  ;;  %v1072_v41 = vadd.f32 %v2339_v30, %v1069_v52  ;;  %v2691_v52 = vld [vmem:[%s2943_s7 + $0x8] sm:$0x7f]  ;;  %1848 = vperm.xlu0 %2330, %v1840_v15  }
 0x107   : > { %v2343_v37 = vpop.eup %2342  ;;  %v1371_v44 = vadd.f32 %v2341_v36, %v1368_v0 }
 0x108   : > { %v2345_v40 = vpop.eup %2344  ;;  %v1670_v48 = vadd.f32 %v2343_v37, %v1667_v38 }
 0x109   : > { %v2347_v43 = vpop.eup %2346  ;;  %v704_v45 = vadd.f32 %v2345_v40, %v697_v57  ;;  %v2698_v57 = vld [vmem:[%s2945_s9] sm:$0xff]  ;;  %932 = vperm.xlu1 %2331, %v568_v25  }
 0x10a   : > { %v2349_v46 = vpop.eup %2348  ;;  %v1071_v47 = vadd.f32 %v2347_v43, %v1064_v8  ;;  %2136 = vmatprep.mubr.msk.f32.mxu0 %vm574_vm1, %v2698_v57  ;;  %2332 = vset.pattern.permute.xlu0 %v2424_v3 }
 0x10b   : > { %v2351_v49 = vpop.eup %2350  ;;  %v1370_v59 = vadd.f32 %v2349_v46, %v1363_v42  ;;  %v2215_v61 = vpack.c.bf16 %v705_v39, %v704_v45  ;;  %1033 = vperm.xlu0 %2332, %v571_v22  }
 0x10c   : > { %v2233_v62 = vpack.c.bf16 %v1072_v41, %v1071_v47  ;;  %v1669_v63 = vadd.f32 %v2351_v49, %v1662_v24  ;;  %v2779_v47 = vld [vmem:[%s2948_s12 + $0x8] sm:$0x7f] }
 0x10d   : > { %v2680_v1 = vpack.c.bf16 %v1371_v44, %v1370_v59  ;;  %2217 = vmatprep.subr.msk.bf16.mxu1 %vm2555_vm3, %v2215_v61  ;;  %1028 = vperm.xlu1 %2331, %v570_v16  }
 0x10e   : > { %v2684_v50 = vpack.c.bf16 %v1670_v48, %v1669_v63  ;;  %2220 = vmatpush3.bf16.msk.msra.mxu1 %vm2555_vm3, %v2215_v61  ;;  %v1156_v63 = vrot.slane %v2638_v29, %v1049_v33 }
 0x10f   : > { %2333 = vset.pattern.permute.xlu0 %v2428_v27 }
 0x111   : > { %2130 = vmatmul.mubr.msk.f32.vlgmr.msra.gmra.mrb[0].mxu1 %vm574_vm1, %v2691_v52 }
 0x112   : > { %2143 = vmatprep.mubr.msk.f32.mxu1 %vm574_vm1, %v2726_v11 }
 0x17b   : > { %v1251_v49 = vpop.permute.xlu0 %1250 }
 0x180   : > { %v2811_v61 = vpop.permute.xlu0 %1544 }
 0x185   : > { %v2820_v12 = vpop.permute.xlu0 %1848 }
 0x18a   : > { %v2826_v17 = vpop.permute.xlu0 %1033 }
 0x1e4   : > { %v2131_v0 = vpop.f32.mrb[0].mxu1 }
 0x1e5   : > { %v797_v2 = vadd.f32 %v2131_v0, %v2659_v51  ;;  %v791_v4 = vpop.f32.mrb[1].mxu1 }
 0x1e6   : > { %v792_v6 = vadd.f32 %v791_v4, %v2672_v60  ;;  %v1158_v4 = vmul.f32 %v1156_v63, %v2676_v21 }
 0x1e7   : > { %2352 = vtanh.f32 %v797_v2 }
 0x1e8   : > { %2354 = vtanh.f32 %v792_v6 }
 0x1f1   : > { %v2353_v7 = vpop.eup %2352 }
 0x1f2   : > { %v2355_v8 = vpop.eup %2354 }
 0x1f3   : > { %v2221_v9 = vpack.c.bf16 %v2353_v7, %v2355_v8  ;;  %v1157_v7 = vmul.f32 %v1156_v63, %v2661_v53 }
 0x1f5   : > { %2223 = vmatprep.subr.msk.bf16.mxu0 %vm2555_vm3, %v2221_v9 }
 0x1f6   : > { %2226 = vmatpush3.bf16.msk.msra.mxu0 %vm2555_vm3, %v2221_v9 }
 0x1f7   : > { %2235 = vmatprep.subr.msk.bf16.mxu0 %vm2555_vm3, %v2233_v62 }
 0x1f9   : > { %2137 = vmatmul.mubr.msk.f32.vlgmr.msra.gmra.mrb[2].mxu0 %vm574_vm1, %v2711_v10 }
 0x1fa   : > { %2238 = vmatpush3.bf16.msk.msra.mxu0 %vm2555_vm3, %v2233_v62  ;;  %2150 = vmatprep.mubr.msk.f32.mxu0 %vm574_vm1, %v2644_v31 }
 0x1fd   : > { %2151 = vmatmul.mubr.msk.f32.vlgmr.msra.gmra.mrb[4].mxu0 %vm574_vm1, %v2691_v52 }
 0x1fe   : > { %2164 = vmatprep.mubr.msk.f32.mxu0 %vm574_vm1, %v2726_v11 }
 0x2cc   : > { %v2138_v20 = vpop.f32.mrb[2].mxu0 }
 0x2cd   : > { %v899_v24 = vadd.f32 %v2138_v20, %v817_v18  ;;  %v893_v28 = vpop.f32.mrb[3].mxu0 }
 0x2ce   : > { %v894_v3 = vadd.f32 %v893_v28, %v816_v23 }
 0x2cf   : > { %v913_v30 = vadd.f32 %v2665_v55, %v899_v24 }
 0x2d0   : > { %v912_v36 = vadd.f32 %v2663_v54, %v894_v3  ;;  %v2152_v37 = vpop.f32.mrb[4].mxu0 }
 0x2d1   : > { %2356 = vtanh.f32 %v913_v30  ;;  %v1148_v27 = vadd.f32 %v2152_v37, %v2659_v51  ;;  %v1142_v38 = vpop.f32.mrb[5].mxu0 }
 0x2d2   : > { %2358 = vtanh.f32 %v912_v36  ;;  %v1143_v56 = vadd.f32 %v1142_v38, %v2672_v60 }
 0x2d3   : > { %2360 = vtanh.f32 %v1148_v27 }
 0x2d4   : > { %2362 = vtanh.f32 %v1143_v56 }
 0x2db   : > { %v2357_v39 = vpop.eup %2356 }
 0x2dc   : > { %v2359_v40 = vpop.eup %2358  ;;  %v929_v41 = vadd.f32 %v2357_v39, %v2668_v58  ;;  %v2803_v58 = vpop.permute.xlu1 %1549 }
 0x2dd   : > { %v2361_v42 = vpop.eup %2360  ;;  %v928_v43 = vadd.f32 %v2359_v40, %v2678_v26 }
 0x2de   : > { %v2363_v44 = vpop.eup %2362 }
 0x2df   : > { %v2227_v45 = vpack.c.bf16 %v929_v41, %v928_v43  ;;  %v2239_v46 = vpack.c.bf16 %v2361_v42, %v2363_v44 }
 0x2e0   : > { %v2805_v26 = vpop.permute.xlu1 %1843 }
 0x2e1   : > { %2229 = vmatprep.subr.msk.bf16.mxu1 %vm2555_vm3, %v2227_v45 }
 0x2e2   : > { %2232 = vmatpush3.bf16.msk.msra.mxu1 %vm2555_vm3, %v2227_v45 }
 0x2e3   : > { %2241 = vmatprep.subr.msk.bf16.mxu1 %vm2555_vm3, %v2239_v46 }
 0x2e4   : > { %v2807_v48 = vpop.permute.xlu1 %937 }
 0x2e5   : > { %2144 = vmatmul.mubr.msk.f32.vlgmr.msra.gmra.mrb[2].mxu1 %vm574_vm1, %v2779_v47 }
 0x2e6   : > { %2244 = vmatpush3.bf16.msk.msra.mxu1 %vm2555_vm3, %v2239_v46  ;;  %2157 = vmatprep.mubr.msk.f32.mxu1 %vm574_vm1, %v2698_v57 }
 0x2e7   : > { %2253 = vmatprep.subr.msk.bf16.mxu1 %vm2555_vm3, %v2680_v1 }
 0x2e8   : > { %v2809_v59 = vpop.permute.xlu1 %932 }
 0x2e9   : > { %2158 = vmatmul.mubr.msk.f32.vlgmr.msra.gmra.mrb[4].mxu1 %vm574_vm1, %v2711_v10 }
 0x2ea   : > { %2256 = vmatpush3.bf16.msk.msra.mxu1 %vm2555_vm3, %v2680_v1  ;;  %2171 = vmatprep.mubr.msk.f32.mxu1 %vm574_vm1, %v2644_v31 }
 0x2ec   : > { %v2828_v18 = vpop.permute.xlu1 %1028 }
 0x2ed   : > { %2172 = vmatmul.mubr.msk.f32.vlgmr.msra.gmra.mrb[6].mxu1 %vm574_vm1, %v2691_v52 }
 0x2ee   : > { %2185 = vmatprep.mubr.msk.f32.mxu1 %vm574_vm1, %v2726_v11 }
 0x3b8   : > { %v2145_v62 = vpop.f32.mrb[2].mxu1 }
 0x3b9   : > { %v1021_v1 = vadd.f32 %v2145_v62, %v2807_v48  ;;  %v1015_v0 = vpop.f32.mrb[3].mxu1  ;;  %v1455_v62 = vrot.slane %v2638_v29, %v1348_v34 }
 0x3ba   : > { %v1016_v2 = vadd.f32 %v1015_v0, %v2809_v59 }
 0x3bb   : > { %2364 = vtanh.f32 %v1021_v1 }
 0x3bc   : > { %2366 = vtanh.f32 %v1016_v2  ;;  %v2159_v6 = vpop.f32.mrb[4].mxu1 }
 0x3bd   : > { %v1234_v8 = vadd.f32 %v2159_v6, %v1158_v4  ;;  %v1228_v9 = vpop.f32.mrb[5].mxu1 }
 0x3be   : > { %v1229_v13 = vadd.f32 %v1228_v9, %v1157_v7 }
 0x3bf   : > { %v1238_v14 = vadd.f32 %v1234_v8, %v2665_v55 }
 0x3c0   : > { %v1237_v33 = vadd.f32 %v1229_v13, %v2663_v54  ;;  %v2173_v15 = vpop.f32.mrb[6].mxu1 }
 0x3c1   : > { %2368 = vtanh.f32 %v1238_v14  ;;  %v1447_v25 = vadd.f32 %v2173_v15, %v2659_v51  ;;  %v1441_v22 = vpop.f32.mrb[7].mxu1 }
 0x3c2   : > { %2370 = vtanh.f32 %v1237_v33  ;;  %v1442_v16 = vadd.f32 %v1441_v22, %v2672_v60 }
 0x3c3   : > { %2372 = vtanh.f32 %v1447_v25 }
 0x3c4   : > { %2374 = vtanh.f32 %v1442_v16 }
 0x3c5   : > { %v2365_v20 = vpop.eup %2364 }
 0x3c6   : > { %v2367_v23 = vpop.eup %2366  ;;  %v1037_v24 = vmul.f32 %v2365_v20, %v2826_v17 }
 0x3c7   : > { %v1036_v28 = vmul.f32 %v2367_v23, %v2828_v18 }
 0x3c8   : > { %v1038_v3 = vsel %vm581_vm0, %v1037_v24, 0.0 }
 0x3c9   : > { %v1039_v30 = vadd.f32 %v1038_v3, %v1036_v28 }
 0x3cb   : > { %v2369_v36 = vpop.eup %2368  ;;  %v1040_v37 = vrot.slane %v1039_v30, 4 }
 0x3cc   : > { %v2371_v27 = vpop.eup %2370  ;;  %v1254_v38 = vadd.f32 %v2369_v36, %v1251_v49 }
 0x3cd   : > { %v2373_v56 = vpop.eup %2372  ;;  %v1041_v39 = vadd.f32 %v1040_v37, %v1039_v30  ;;  %v1253_v40 = vadd.f32 %v2371_v27, %v2674_v19 }
 0x3ce   : > { %v2375_v41 = vpop.eup %2374 }
 0x3cf   : > { %v1042_v42 = vrot.slane %v1041_v39, 2  ;;  %v2245_v43 = vpack.c.bf16 %v1254_v38, %v1253_v40  ;;  %v2257_v44 = vpack.c.bf16 %v2373_v56, %v2375_v41 }
 0x3d1   : > { %v1043_v45 = vadd.f32 %v1042_v42, %v1041_v39  ;;  %2247 = vmatprep.subr.msk.bf16.mxu0 %vm2555_vm3, %v2245_v43  ;;  %v1754_v39 = vrot.slane %v2638_v29, %v1647_v35 }
 0x3d2   : > { %2250 = vmatpush3.bf16.msk.msra.mxu0 %vm2555_vm3, %v2245_v43 }
 0x3d3   : > { %v1044_v46 = vrot.slane %v1043_v45, 1  ;;  %2259 = vmatprep.subr.msk.bf16.mxu0 %vm2555_vm3, %v2257_v44  ;;  %v1756_v43 = vmul.f32 %v1754_v39, %v2676_v21 }
 0x3d5   : > { %v1045_v19 = vadd.f32 %v1044_v46, %v1043_v45  ;;  %2165 = vmatmul.mubr.msk.f32.vlgmr.msra.gmra.mrb[6].mxu0 %vm574_vm1, %v2779_v47 }
 0x3d6   : > { %2262 = vmatpush3.bf16.msk.msra.mxu0 %vm2555_vm3, %v2257_v44  ;;  %2178 = vmatprep.mubr.msk.f32.mxu0 %vm574_vm1, %v2698_v57 }
 0x3d7   : > { %1046 = vst [vmem:[%s2845_s27] sm:$0x1] %v1045_v19  ;;  %2271 = vmatprep.subr.msk.bf16.mxu0 %vm2555_vm3, %v2684_v50 }
 0x3d9   : > { %2179 = vmatmul.mubr.msk.f32.vlgmr.msra.gmra.mrb[8].mxu0 %vm574_vm1, %v2711_v10 }
 0x3da   : > { %2274 = vmatpush3.bf16.msk.msra.mxu0 %vm2555_vm3, %v2684_v50  ;;  %2192 = vmatprep.mubr.msk.f32.mxu0 %vm574_vm1, %v2644_v31  ;;  %v1457_v50 = vmul.f32 %v1455_v62, %v2676_v21 }
 0x3dd   : > { %2193 = vmatmul.mubr.msk.f32.vlgmr.msra.gmra.mrb[10].mxu0 %vm574_vm1, %v2691_v52  ;;  %v1456_v52 = vmul.f32 %v1455_v62, %v2661_v53 }
 0x3de   : > { %2206 = vmatprep.mubr.msk.f32.mxu0 %vm574_vm1, %v2726_v11 }
 0x4a8   : > { %v2166_v49 = vpop.f32.mrb[6].mxu0 }
 0x4a9   : > { %v1330_v63 = vadd.f32 %v2166_v49, %v2807_v48  ;;  %v1324_v1 = vpop.f32.mrb[7].mxu0 }
 0x4aa   : > { %v1325_v0 = vadd.f32 %v1324_v1, %v2809_v59 }
 0x4ab   : > { %2376 = vtanh.f32 %v1330_v63 }
 0x4ac   : > { %2378 = vtanh.f32 %v1325_v0  ;;  %v2180_v31 = vpop.f32.mrb[8].mxu0 }
 0x4ad   : > { %v1533_v2 = vadd.f32 %v2180_v31, %v1457_v50  ;;  %v1527_v4 = vpop.f32.mrb[9].mxu0 }
 0x4ae   : > { %v1528_v11 = vadd.f32 %v1527_v4, %v1456_v52 }
 0x4af   : > { %v1537_v6 = vadd.f32 %v1533_v2, %v2665_v55 }
 0x4b0   : > { %v1536_v7 = vadd.f32 %v1528_v11, %v2663_v54  ;;  %v2194_v34 = vpop.f32.mrb[10].mxu0 }
 0x4b1   : > { %2380 = vtanh.f32 %v1537_v6  ;;  %v1746_v8 = vadd.f32 %v2194_v34, %v2659_v51  ;;  %v1740_v9 = vpop.f32.mrb[11].mxu0 }
 0x4b2   : > { %2382 = vtanh.f32 %v1536_v7  ;;  %v1741_v13 = vadd.f32 %v1740_v9, %v2672_v60 }
 0x4b3   : > { %2384 = vtanh.f32 %v1746_v8 }
 0x4b4   : > { %2386 = vtanh.f32 %v1741_v13 }
 0x4b5   : > { %v2377_v14 = vpop.eup %2376 }
 0x4b6   : > { %v2379_v33 = vpop.eup %2378  ;;  %v1336_v15 = vmul.f32 %v2377_v14, %v2826_v17 }
 0x4b7   : > { %v1335_v25 = vmul.f32 %v2379_v33, %v2828_v18 }
 0x4b8   : > { %v1337_v22 = vsel %vm581_vm0, %v1336_v15, 0.0 }
 0x4b9   : > { %v1338_v16 = vadd.f32 %v1337_v22, %v1335_v25 }
 0x4bb   : > { %v2381_v20 = vpop.eup %2380  ;;  %v1339_v23 = vrot.slane %v1338_v16, 4 }
 0x4bc   : > { %v2383_v24 = vpop.eup %2382  ;;  %v1553_v51 = vadd.f32 %v2381_v20, %v2803_v58 }
 0x4bd   : > { %v2385_v28 = vpop.eup %2384  ;;  %v1340_v3 = vadd.f32 %v1339_v23, %v1338_v16  ;;  %v1552_v60 = vadd.f32 %v2383_v24, %v2811_v61 }
 0x4be   : > { %v2387_v30 = vpop.eup %2386 }
 0x4bf   : > { %v1341_v36 = vrot.slane %v1340_v3, 2  ;;  %v2263_v37 = vpack.c.bf16 %v1553_v51, %v1552_v60  ;;  %v2275_v27 = vpack.c.bf16 %v2385_v28, %v2387_v30 }
 0x4c1   : > { %v1342_v38 = vadd.f32 %v1341_v36, %v1340_v3  ;;  %2265 = vmatprep.subr.msk.bf16.mxu1 %vm2555_vm3, %v2263_v37 }
 0x4c2   : > { %2268 = vmatpush3.bf16.msk.msra.mxu1 %vm2555_vm3, %v2263_v37 }
 0x4c3   : > { %v1343_v56 = vrot.slane %v1342_v38, 1  ;;  %2277 = vmatprep.subr.msk.bf16.mxu1 %vm2555_vm3, %v2275_v27 }
 0x4c5   : > { %v1344_v58 = vadd.f32 %v1343_v56, %v1342_v38  ;;  %2186 = vmatmul.mubr.msk.f32.vlgmr.msra.gmra.mrb[8].mxu1 %vm574_vm1, %v2779_v47 }
 0x4c6   : > { %2280 = vmatpush3.bf16.msk.msra.mxu1 %vm2555_vm3, %v2275_v27  ;;  %2199 = vmatprep.mubr.msk.f32.mxu1 %vm574_vm1, %v2698_v57  ;;  %v1755_v57 = vmul.f32 %v1754_v39, %v2661_v53 }
 0x4c7   : > { %1345 = vst [vmem:[%s2845_s27 + $0x1] sm:$0x1] %v1344_v58 }
 0x4c9   : > { %2200 = vmatmul.mubr.msk.f32.vlgmr.msra.gmra.mrb[10].mxu1 %vm574_vm1, %v2711_v10 }
 0x598   : > { %v2187_v61 = vpop.f32.mrb[8].mxu1 }
 0x599   : > { %v1629_v40 = vadd.f32 %v2187_v61, %v2807_v48  ;;  %v1623_v41 = vpop.f32.mrb[9].mxu1 }
 0x59a   : > { %v1624_v42 = vadd.f32 %v1623_v41, %v2809_v59 }
 0x59b   : > { %2388 = vtanh.f32 %v1629_v40 }
 0x59c   : > { %2390 = vtanh.f32 %v1624_v42  ;;  %v2201_v44 = vpop.f32.mrb[10].mxu1 }
 0x59d   : > { %v1832_v45 = vadd.f32 %v2201_v44, %v1756_v43  ;;  %v1826_v46 = vpop.f32.mrb[11].mxu1 }
 0x59e   : > { %v1827_v10 = vadd.f32 %v1826_v46, %v1755_v57 }
 0x59f   : > { %v1836_v19 = vadd.f32 %v1832_v45, %v2665_v55 }
 0x5a0   : > { %v1835_v32 = vadd.f32 %v1827_v10, %v2663_v54 }
 0x5a1   : > { %2392 = vtanh.f32 %v1836_v19 }
 0x5a2   : > { %2394 = vtanh.f32 %v1835_v32 }
 0x5a5   : > { %v2389_v29 = vpop.eup %2388 }
 0x5a6   : > { %v2391_v35 = vpop.eup %2390  ;;  %v1635_v49 = vmul.f32 %v2389_v29, %v2826_v17 }
 0x5a7   : > { %v1634_v62 = vmul.f32 %v2391_v35, %v2828_v18 }
 0x5a8   : > { %v1636_v21 = vsel %vm581_vm0, %v1635_v49, 0.0 }
 0x5a9   : > { %v1637_v63 = vadd.f32 %v1636_v21, %v1634_v62 }
 0x5ab   : > { %v2393_v53 = vpop.eup %2392  ;;  %v1638_v1 = vrot.slane %v1637_v63, 4 }
 0x5ac   : > { %v2395_v0 = vpop.eup %2394  ;;  %v1852_v50 = vadd.f32 %v2393_v53, %v2820_v12 }
 0x5ad   : > { %v1639_v55 = vadd.f32 %v1638_v1, %v1637_v63  ;;  %v1851_v54 = vadd.f32 %v2395_v0, %v2805_v26 }
 0x5af   : > { %v1640_v31 = vrot.slane %v1639_v55, 2  ;;  %v2281_v52 = vpack.c.bf16 %v1852_v50, %v1851_v54 }
 0x5b1   : > { %v1641_v2 = vadd.f32 %v1640_v31, %v1639_v55  ;;  %2283 = vmatprep.subr.msk.bf16.mxu0 %vm2555_vm3, %v2281_v52 }
 0x5b2   : > { %2286 = vmatpush3.bf16.msk.msra.mxu0 %vm2555_vm3, %v2281_v52 }
 0x5b3   : > { %v1642_v4 = vrot.slane %v1641_v2, 1 }
 0x5b5   : > { %v1643_v11 = vadd.f32 %v1642_v4, %v1641_v2  ;;  %2207 = vmatmul.mubr.msk.f32.vlgmr.msra.gmra.mrb[12].mxu0 %vm574_vm1, %v2779_v47 }
 0x5b7   : > { %1644 = vst [vmem:[%s2845_s27 + $0x2] sm:$0x1] %v1643_v11 }
 0x688   : > { %v2208_v6 = vpop.f32.mrb[12].mxu0 }
 0x689   : > { %v1928_v12 = vadd.f32 %v2208_v6, %v2807_v48  ;;  %v1922_v7 = vpop.f32.mrb[13].mxu0 }
 0x68a   : > { %v1923_v26 = vadd.f32 %v1922_v7, %v2809_v59 }
 0x68b   : > { %2396 = vtanh.f32 %v1928_v12 }
 0x68c   : > { %2398 = vtanh.f32 %v1923_v26 }
 0x695   : > { %v2397_v34 = vpop.eup %2396 }
 0x696   : > { %v2399_v8 = vpop.eup %2398  ;;  %v1934_v5 = vmul.f32 %v2397_v34, %v2826_v17 }
 0x697   : > { %v1933_v9 = vmul.f32 %v2399_v8, %v2828_v18 }
 0x698   : > { %v1935_v13 = vsel %vm581_vm0, %v1934_v5, 0.0 }
 0x699   : > { %v1936_v14 = vadd.f32 %v1935_v13, %v1933_v9 }
 0x69b   : > { %v1937_v47 = vrot.slane %v1936_v14, 4 }
 0x69d   : > { %v1938_v33 = vadd.f32 %v1937_v47, %v1936_v14 }
 0x69f   : > { %v1939_v15 = vrot.slane %v1938_v33, 2 }
 0x6a1   : > { %v1940_v25 = vadd.f32 %v1939_v15, %v1938_v33 }
 0x6a3   : > { %v1941_v48 = vrot.slane %v1940_v25, 1 }
 0x6a5   : > { %v1942_v22 = vadd.f32 %v1941_v48, %v1940_v25 }
 0x6a7   : > { %1943 = vst [vmem:[%s2845_s27 + $0x3] sm:$0x1] %v1942_v22 }
 0x6a8 PF: > { %p22_p9 = scmp.ge.s32.totalorder %s2526_s22, 4   ;;  %s2954_s18 = smov %s2418_s19 }
 0x6a9   : > { %s2955_s19 = smov %s2535_s25  ;;  %s2956_s20 = smov %s2526_s22 }
 0x6aa   :  { %24 = sbr.rel (!%p22_p9) target bundleno = 2 (0x2), region = 156 }

</bundles_post_ra>
